<compile_context>
chip_gen: v7x
topology: tpu7x:2x2x1
jax: 0.10.0
libtpu: 0.0.40
codegen_flags: <defaults>
</compile_context>

<pallas_src>
import math

import jax
import jax.numpy as jnp
import numpy as np
from jax.experimental import pallas as pl
from jax.experimental.pallas import tpu as pltpu

# ---- small, module-consistent config (defaults of the PyTorch TransformerBlock) ----
B, T, DIM = 2, 8, 32
HEADS = 8
DIM_HEAD = DIM // HEADS          # default dim_head = dim / heads -> 4
INNER = HEADS * DIM_HEAD         # _dim -> 32
DIM_FF = 64                      # dim_linear_block (kept small for the example)
EPS = 1e-5                       # nn.LayerNorm default eps
SCALE = DIM_HEAD ** (-0.5)


def transformer_block_kernel(x_ref, wqkv_ref, sel_ref, selt_ref, w0_ref,
                             g1_ref, be1_ref, w1_ref, b1_ref, w2_ref, b2_ref,
                             g2_ref, be2_ref, out_ref):
    """One batch-tile (b_tile full sequences): fused MHSA + residual/LN + MLP + residual/LN."""
    b_tile, t, dim = x_ref.shape
    inner = wqkv_ref.shape[1] // 3
    heads = sel_ref.shape[1]
    rows = b_tile * t

    x3 = x_ref[...]                                       # (b_tile, t, dim) f32
    xf = x3.reshape(rows, dim)

    # ---- fused QKV projection: ONE MXU matmul; bf16 operands, f32 accumulate.
    # SCALE is already folded into the Q columns of wqkv (done wrapper-side).
    qkv = jnp.dot(xf.astype(jnp.bfloat16), wqkv_ref[...],
                  preferred_element_type=jnp.float32)      # (rows, 3*inner)
    q = qkv[:, 0:inner].reshape(b_tile, t, inner)          # lanes are head-major (h, d)
    k = qkv[:, inner:2 * inner].reshape(b_tile, t, inner)
    v = qkv[:, 2 * inner:3 * inner].reshape(b_tile, t, inner)

    # ---- scores: s[b,i,j,h] = sum_d q[b,i,(h,d)] * k[b,j,(h,d)]   (scale pre-folded)
    # VPU broadcast-multiply + one segment-sum matmul against the 0/1 head selector.
    # Scores kept f32 going into softmax.
    # TODO(synk): optional boolean `mask` (masked_fill with -inf) not implemented;
    #             this kernel is the mask=None forward path.
    prod = q[:, :, None, :] * k[:, None, :, :]             # (b_tile, t, t, inner) f32
    s = jnp.dot(prod.reshape(rows * t, inner), sel_ref[...],
                preferred_element_type=jnp.float32)        # (b_tile*t*t, heads)
    s = s.reshape(b_tile, t, t, heads)

    # softmax over j (sublane axis), f32; reciprocal goes to the EUP slot.
    s = s - jnp.max(s, axis=2, keepdims=True)
    p = jnp.exp(s)
    denom = jnp.sum(p, axis=2, keepdims=True)
    p = p * pl.reciprocal(denom, approx=True)   # ~2^-13 rel err; switch to approx=False if tolerance tightens

    # ---- p.v as ONE MXU matmul per batch against a block-diagonal V:
    #   Vbd[b, j*H+h, c] = v[b, j, c] * sel_t[h, c]   (non-zero only where c // DH == h)
    #   o[b, i, c]       = sum_{j,h} p[b, i, j, h] * Vbd[b, j*H+h, c]
    # Removes the (b,t,t,inner) expanded-p slab, the broadcast-v multiply and the
    # sublane reduce of the previous version.
    vbd = (v[:, :, None, :] * selt_ref[...][None, None, :, :]).reshape(b_tile, t * heads, inner)
    p2 = p.reshape(b_tile, t, t * heads)
    o = jnp.einsum('bij,bjc->bic', p2.astype(jnp.bfloat16), vbd.astype(jnp.bfloat16),
                   preferred_element_type=jnp.float32)     # (b_tile, t, inner)
    o = o.reshape(rows, inner)                             # lanes stay (h, d)-major

    # W_0 consumes the head-major lanes directly (rows of w0_t are (h d)-ordered).
    attn = jnp.dot(o.astype(jnp.bfloat16), w0_ref[...],
                   preferred_element_type=jnp.float32)     # (rows, dim)

    # ---- residual + LayerNorm 1 (dropout == identity in eval mode).
    # var = E[y^2] - mu^2: both lane reductions issue back-to-back.
    y = attn + xf
    mu = jnp.mean(y, axis=-1, keepdims=True)
    var = jnp.mean(y * y, axis=-1, keepdims=True) - mu * mu
    y = (y - mu) * jax.lax.rsqrt(var + EPS) * g1_ref[...] + be1_ref[...]

    # ---- MLP: Linear -> GELU(exact, erf) -> Linear (elementwise math stays f32).
    h1 = jnp.dot(y.astype(jnp.bfloat16), w1_ref[...],
                 preferred_element_type=jnp.float32) + b1_ref[...]
    h1 = 0.5 * h1 * (1.0 + jax.lax.erf(h1 * (1.0 / math.sqrt(2.0))))
    ff = jnp.dot(h1.astype(jnp.bfloat16), w2_ref[...],
                 preferred_element_type=jnp.float32) + b2_ref[...]

    # ---- residual + LayerNorm 2
    z = ff + y
    mu2 = jnp.mean(z, axis=-1, keepdims=True)
    var2 = jnp.mean(z * z, axis=-1, keepdims=True) - mu2 * mu2
    out = (z - mu2) * jax.lax.rsqrt(var2 + EPS) * g2_ref[...] + be2_ref[...]
    out_ref[...] = out.reshape(b_tile, t, dim)


def transformer_block(x, wqkv_t, sel, sel_t, w0_t, g1, be1, w1_t, b1, w2_t, b2,
                      g2, be2, *, target_rows_per_step=128):
    """Batch-tiled grid: each step handles b_tile whole sequences (~target_rows rows) on a
    "parallel" grid axis (both TensorCores on v7x); weights stay resident in VMEM."""
    bsz, t, dim = x.shape
    b_tile = max(1, min(bsz, max(1, target_rows_per_step // t)))
    while bsz % b_tile:       # keep tiles exact: attention couples rows within a sequence
        b_tile -= 1
    grid = (pl.cdiv(bsz, b_tile),)

    def full_spec(a):
        nd = a.ndim
        return pl.BlockSpec(a.shape, lambda b, _nd=nd: (0,) * _nd)

    weights = (wqkv_t, sel, sel_t, w0_t, g1, be1, w1_t, b1, w2_t, b2, g2, be2)
    in_specs = [pl.BlockSpec((b_tile, t, dim), lambda b: (b, 0, 0))]
    in_specs += [full_spec(a) for a in weights]

    # TODO(synk): for long sequences the (t, t, ...) attention intermediates must be
    # converted to a flash-style q-tile/kv-tile grid with VMEM accumulators; size the
    # tiles for v7x's 64 MiB VMEM and raise vmem_limit_bytes with headroom.
    out = pl.pallas_call(
        transformer_block_kernel,
        out_shape=jax.ShapeDtypeStruct((bsz, t, dim), jnp.float32),
        grid=grid,
        in_specs=in_specs,
        out_specs=pl.BlockSpec((b_tile, t, dim), lambda b: (b, 0, 0)),
        compiler_params=pltpu.CompilerParams(dimension_semantics=("parallel",)),
    )(x, *weights)
    return out


# ---------- pure-JAX reference (mirrors the PyTorch forward exactly, all f32) ----------
def reference(x, w_qkv, w0, g1, be1, w1, b1, w2, b2, g2, be2):
    qkv = jnp.einsum('btc,oc->bto', x, w_qkv)                      # to_qvk (no bias)
    qkv = qkv.reshape(B, T, DIM_HEAD, 3, HEADS)                    # '(d k h)'
    q = jnp.transpose(qkv[..., 0, :], (0, 3, 1, 2))                # b h t d
    k = jnp.transpose(qkv[..., 1, :], (0, 3, 1, 2))
    v = jnp.transpose(qkv[..., 2, :], (0, 3, 1, 2))
    s = jnp.einsum('bhid,bhjd->bhij', q, k) * SCALE
    a = jax.nn.softmax(s, axis=-1)
    o = jnp.einsum('bhij,bhjd->bhid', a, v)
    o = jnp.transpose(o, (0, 2, 1, 3)).reshape(B, T, INNER)        # b t (h d)
    attn = jnp.einsum('bti,oi->bto', o, w0)                        # W_0 (no bias)

    def ln(z, g, bb):
        mu = z.mean(-1, keepdims=True)
        var = ((z - mu) ** 2).mean(-1, keepdims=True)
        return (z - mu) / jnp.sqrt(var + EPS) * g.reshape(1, 1, -1) + bb.reshape(1, 1, -1)

    y = ln(attn + x, g1, be1)
    h1 = jnp.einsum('btd,fd->btf', y, w1) + b1.reshape(1, 1, -1)
    h1 = 0.5 * h1 * (1.0 + jax.lax.erf(h1 / jnp.sqrt(2.0)))        # nn.GELU (exact)
    ff = jnp.einsum('btf,df->btd', h1, w2) + b2.reshape(1, 1, -1)
    return ln(ff + y, g2, be2)


if __name__ == "__main__":
    key = jax.random.PRNGKey(0)
    ks = jax.random.split(key, 8)

    # deterministic synthetic parameters (PyTorch weight conventions: (out, in))
    x = jax.random.normal(ks[0], (B, T, DIM), jnp.float32)
    w_qkv = jax.random.normal(ks[1], (3 * INNER, DIM), jnp.float32) * 0.05   # to_qvk
    w0 = jax.random.normal(ks[2], (DIM, INNER), jnp.float32) * 0.05          # W_0
    g1, be1 = jnp.ones((1, DIM), jnp.float32), jnp.zeros((1, DIM), jnp.float32)  # LayerNorm defaults
    g2, be2 = jnp.ones((1, DIM), jnp.float32), jnp.zeros((1, DIM), jnp.float32)
    w1 = jax.random.normal(ks[3], (DIM_FF, DIM), jnp.float32) * 0.05
    b1 = jax.random.normal(ks[4], (1, DIM_FF), jnp.float32) * 0.05
    w2 = jax.random.normal(ks[5], (DIM, DIM_FF), jnp.float32) * 0.05
    b2 = jax.random.normal(ks[6], (1, DIM), jnp.float32) * 0.05

    # ---- wrapper-side weight preprocessing (host, once) ----
    # Fuse the to_qvk weight into a (DIM, 3*INNER) matrix whose columns are ordered
    # (qkv-block, head, dim_head) so the kernel does ONE x @ Wqkv and lanes stay (h, d)-major.
    # PyTorch rows follow the einops '(d k h)' factorization: row = (d*3 + k)*HEADS + h.
    w_qkv_r = w_qkv.reshape(DIM_HEAD, 3, HEADS, DIM)                          # [d, k, h, :]
    wqkv_t = jnp.transpose(w_qkv_r, (1, 2, 0, 3)).reshape(3 * INNER, DIM).T   # (DIM, 3*INNER)
    # Fold the attention scale into the Q columns (kernel has no explicit * SCALE).
    col_scale = jnp.concatenate([jnp.full((INNER,), SCALE, jnp.float32),
                                 jnp.ones((2 * INNER,), jnp.float32)])
    wqkv_t = (wqkv_t * col_scale[None, :]).astype(jnp.bfloat16)               # bf16 MXU operand
    w0_t = w0.T.astype(jnp.bfloat16)          # (INNER, DIM); rows already (h d)-major
    w1_t = w1.T.astype(jnp.bfloat16)          # (DIM, DIM_FF)
    w2_t = w2.T.astype(jnp.bfloat16)          # (DIM_FF, DIM)

    # Host-precomputed 0/1 head-selector matrices (f32: used in the f32 score matmul).
    hd = np.arange(INNER)[:, None] // DIM_HEAD
    sel_np = (hd == np.arange(HEADS)[None, :]).astype(np.float32)
    sel = jnp.asarray(sel_np)                  # (INNER, HEADS)
    sel_t = jnp.asarray(sel_np.T)              # (HEADS, INNER)

    out = transformer_block(x, wqkv_t, sel, sel_t, w0_t, g1, be1, w1_t, b1,
                            w2_t, b2, g2, be2)
    out = jax.block_until_ready(out)

    ref = reference(x, w_qkv, w0, g1, be1, w1, b1, w2, b2, g2, be2)
    # tolerance sized for bf16 MXU operands vs. the exact-f32 reference
    np.testing.assert_allclose(np.asarray(out), np.asarray(ref), rtol=1e-2, atol=1e-2)

    print("KERNEL_OK")
</pallas_src>

<mosaic_0001>
module attributes {stable_mosaic.version = 11 : i64} {
  func.func @transformer_block_kernel(%arg0: i32, %arg1: memref<2x8x32xf32, #tpu.memory_space<vmem>>, %arg2: memref<32x96xbf16, #tpu.memory_space<vmem>>, %arg3: memref<32x8xf32, #tpu.memory_space<vmem>>, %arg4: memref<8x32xf32, #tpu.memory_space<vmem>>, %arg5: memref<32x32xbf16, #tpu.memory_space<vmem>>, %arg6: memref<1x32xf32, #tpu.memory_space<vmem>>, %arg7: memref<1x32xf32, #tpu.memory_space<vmem>>, %arg8: memref<32x64xbf16, #tpu.memory_space<vmem>>, %arg9: memref<1x64xf32, #tpu.memory_space<vmem>>, %arg10: memref<64x32xbf16, #tpu.memory_space<vmem>>, %arg11: memref<1x32xf32, #tpu.memory_space<vmem>>, %arg12: memref<1x32xf32, #tpu.memory_space<vmem>>, %arg13: memref<1x32xf32, #tpu.memory_space<vmem>>, %arg14: memref<2x8x32xf32, #tpu.memory_space<vmem>>) attributes {dimension_semantics = [#tpu.dimension_semantics<parallel>], iteration_bounds = array<i64: 1>, scalar_prefetch = 0 : i64, scratch_operands = 0 : i64, tpu.core_type = #tpu.core_type<tc>, window_params = [{transform_indices = @transform_0, window_bounds = array<i64: 2, 8, 32>}, {pipeline_mode = #tpu.pipeline_mode<synchronous>, transform_indices = @transform_1, window_bounds = array<i64: 32, 96>}, {pipeline_mode = #tpu.pipeline_mode<synchronous>, transform_indices = @transform_2, window_bounds = array<i64: 32, 8>}, {pipeline_mode = #tpu.pipeline_mode<synchronous>, transform_indices = @transform_3, window_bounds = array<i64: 8, 32>}, {pipeline_mode = #tpu.pipeline_mode<synchronous>, transform_indices = @transform_4, window_bounds = array<i64: 32, 32>}, {pipeline_mode = #tpu.pipeline_mode<synchronous>, transform_indices = @transform_5, window_bounds = array<i64: 1, 32>}, {pipeline_mode = #tpu.pipeline_mode<synchronous>, transform_indices = @transform_6, window_bounds = array<i64: 1, 32>}, {pipeline_mode = #tpu.pipeline_mode<synchronous>, transform_indices = @transform_7, window_bounds = array<i64: 32, 64>}, {pipeline_mode = #tpu.pipeline_mode<synchronous>, transform_indices = @transform_8, window_bounds = array<i64: 1, 64>}, {pipeline_mode = #tpu.pipeline_mode<synchronous>, transform_indices = @transform_9, window_bounds = array<i64: 64, 32>}, {pipeline_mode = #tpu.pipeline_mode<synchronous>, transform_indices = @transform_10, window_bounds = array<i64: 1, 32>}, {pipeline_mode = #tpu.pipeline_mode<synchronous>, transform_indices = @transform_11, window_bounds = array<i64: 1, 32>}, {pipeline_mode = #tpu.pipeline_mode<synchronous>, transform_indices = @transform_12, window_bounds = array<i64: 1, 32>}, {transform_indices = @transform_13, window_bounds = array<i64: 2, 8, 32>}]} {
    %c0 = arith.constant 0 : index
    %c0_0 = arith.constant 0 : index
    %c0_1 = arith.constant 0 : index
    %0 = vector.load %arg1[%c0, %c0_0, %c0_1] : memref<2x8x32xf32, #tpu.memory_space<vmem>>, vector<2x8x32xf32>
    %1 = vector.shape_cast %0 : vector<2x8x32xf32> to vector<16x32xf32>
    %2 = arith.truncf %1 : vector<16x32xf32> to vector<16x32xbf16>
    %c0_2 = arith.constant 0 : index
    %c0_3 = arith.constant 0 : index
    %3 = vector.load %arg2[%c0_2, %c0_3] : memref<32x96xbf16, #tpu.memory_space<vmem>>, vector<32x96xbf16>
    %cst = arith.constant dense<0.000000e+00> : vector<16x96xf32>
    %4 = tpu.matmul %2, %3, %cst {dimension_numbers = #tpu.dot_dimension_numbers<[1], [0], [0], [1], [0, 0, 1, 1], [], []>} : vector<16x32xbf16>, vector<32x96xbf16>, vector<16x96xf32> -> vector<16x96xf32>
    %5 = vector.extract_strided_slice %4 {offsets = [0, 0], sizes = [16, 32], strides = [1, 1]} : vector<16x96xf32> to vector<16x32xf32>
    %6 = vector.shape_cast %5 : vector<16x32xf32> to vector<2x8x32xf32>
    %7 = vector.extract_strided_slice %4 {offsets = [0, 32], sizes = [16, 32], strides = [1, 1]} : vector<16x96xf32> to vector<16x32xf32>
    %8 = vector.shape_cast %7 : vector<16x32xf32> to vector<2x8x32xf32>
    %9 = vector.extract_strided_slice %4 {offsets = [0, 64], sizes = [16, 32], strides = [1, 1]} : vector<16x96xf32> to vector<16x32xf32>
    %10 = vector.shape_cast %9 : vector<16x32xf32> to vector<2x8x32xf32>
    %11 = vector.shape_cast %6 : vector<2x8x32xf32> to vector<2x8x1x32xf32>
    %12 = vector.shape_cast %8 : vector<2x8x32xf32> to vector<2x1x8x32xf32>
    %13 = vector.broadcast %11 : vector<2x8x1x32xf32> to vector<2x8x8x32xf32>
    %14 = vector.broadcast %12 : vector<2x1x8x32xf32> to vector<2x8x8x32xf32>
    %15 = arith.mulf %13, %14 : vector<2x8x8x32xf32>
    %16 = vector.shape_cast %15 : vector<2x8x8x32xf32> to vector<128x32xf32>
    %c0_4 = arith.constant 0 : index
    %c0_5 = arith.constant 0 : index
    %17 = vector.load %arg3[%c0_4, %c0_5] : memref<32x8xf32, #tpu.memory_space<vmem>>, vector<32x8xf32>
    %cst_6 = arith.constant dense<0.000000e+00> : vector<128x8xf32>
    %18 = tpu.matmul %16, %17, %cst_6 {dimension_numbers = #tpu.dot_dimension_numbers<[1], [0], [0], [1], [0, 0, 1, 1], [], []>} : vector<128x32xf32>, vector<32x8xf32>, vector<128x8xf32> -> vector<128x8xf32>
    %19 = vector.shape_cast %18 : vector<128x8xf32> to vector<2x8x8x8xf32>
    %cst_7 = arith.constant dense<0xFF800000> : vector<2x8x8xf32>
    %20 = vector.multi_reduction <maximumf>, %19, %cst_7 [2] : vector<2x8x8x8xf32> to vector<2x8x8xf32>
    %21 = vector.shape_cast %20 : vector<2x8x8xf32> to vector<2x8x1x8xf32>
    %22 = vector.broadcast %21 : vector<2x8x1x8xf32> to vector<2x8x8x8xf32>
    %23 = arith.subf %19, %22 : vector<2x8x8x8xf32>
    %24 = math.exp %23 : vector<2x8x8x8xf32>
    %cst_8 = arith.constant dense<0.000000e+00> : vector<2x8x8xf32>
    %25 = vector.multi_reduction <add>, %24, %cst_8 [2] : vector<2x8x8x8xf32> to vector<2x8x8xf32>
    %26 = vector.shape_cast %25 : vector<2x8x8xf32> to vector<2x8x1x8xf32>
    %27 = tpu.reciprocal %26 {approx = true} : vector<2x8x1x8xf32> -> vector<2x8x1x8xf32>
    %28 = vector.broadcast %27 : vector<2x8x1x8xf32> to vector<2x8x8x8xf32>
    %29 = arith.mulf %24, %28 : vector<2x8x8x8xf32>
    %30 = vector.shape_cast %10 : vector<2x8x32xf32> to vector<2x8x1x32xf32>
    %c0_9 = arith.constant 0 : index
    %c0_10 = arith.constant 0 : index
    %31 = vector.load %arg4[%c0_9, %c0_10] : memref<8x32xf32, #tpu.memory_space<vmem>>, vector<8x32xf32>
    %32 = vector.shape_cast %31 : vector<8x32xf32> to vector<1x1x8x32xf32>
    %33 = vector.broadcast %30 : vector<2x8x1x32xf32> to vector<2x8x8x32xf32>
    %34 = vector.broadcast %32 : vector<1x1x8x32xf32> to vector<2x8x8x32xf32>
    %35 = arith.mulf %33, %34 : vector<2x8x8x32xf32>
    %36 = vector.shape_cast %35 : vector<2x8x8x32xf32> to vector<2x64x32xf32>
    %37 = vector.shape_cast %29 : vector<2x8x8x8xf32> to vector<2x8x64xf32>
    %38 = arith.truncf %37 : vector<2x8x64xf32> to vector<2x8x64xbf16>
    %39 = arith.truncf %36 : vector<2x64x32xf32> to vector<2x64x32xbf16>
    "tpu.trace_start"() <{level = 10 : i32, message = "bij,bjc->bic"}> : () -> ()
    %cst_11 = arith.constant dense<0.000000e+00> : vector<2x8x32xf32>
    %40 = tpu.matmul %38, %39, %cst_11 {dimension_numbers = #tpu.dot_dimension_numbers<[2], [1], [1], [2], [0, 0, 0, 1, 1, 2], [0], [0]>} : vector<2x8x64xbf16>, vector<2x64x32xbf16>, vector<2x8x32xf32> -> vector<2x8x32xf32>
    "tpu.trace_stop"() : () -> ()
    %41 = vector.shape_cast %40 : vector<2x8x32xf32> to vector<16x32xf32>
    %42 = arith.truncf %41 : vector<16x32xf32> to vector<16x32xbf16>
    %c0_12 = arith.constant 0 : index
    %c0_13 = arith.constant 0 : index
    %43 = vector.load %arg5[%c0_12, %c0_13] : memref<32x32xbf16, #tpu.memory_space<vmem>>, vector<32x32xbf16>
    %cst_14 = arith.constant dense<0.000000e+00> : vector<16x32xf32>
    %44 = tpu.matmul %42, %43, %cst_14 {dimension_numbers = #tpu.dot_dimension_numbers<[1], [0], [0], [1], [0, 0, 1, 1], [], []>} : vector<16x32xbf16>, vector<32x32xbf16>, vector<16x32xf32> -> vector<16x32xf32>
    %45 = arith.addf %44, %1 : vector<16x32xf32>
    %cst_15 = arith.constant dense<0.000000e+00> : vector<16xf32>
    %46 = vector.multi_reduction <add>, %45, %cst_15 [1] : vector<16x32xf32> to vector<16xf32>
    %47 = vector.shape_cast %46 : vector<16xf32> to vector<16x1xf32>
    %cst_16 = arith.constant 3.200000e+01 : f32
    %48 = vector.broadcast %cst_16 : f32 to vector<16x1xf32>
    %49 = arith.divf %47, %48 : vector<16x1xf32>
    %50 = arith.mulf %45, %45 : vector<16x32xf32>
    %cst_17 = arith.constant dense<0.000000e+00> : vector<16xf32>
    %51 = vector.multi_reduction <add>, %50, %cst_17 [1] : vector<16x32xf32> to vector<16xf32>
    %52 = vector.shape_cast %51 : vector<16xf32> to vector<16x1xf32>
    %cst_18 = arith.constant 3.200000e+01 : f32
    %53 = vector.broadcast %cst_18 : f32 to vector<16x1xf32>
    %54 = arith.divf %52, %53 : vector<16x1xf32>
    %55 = arith.mulf %49, %49 : vector<16x1xf32>
    %56 = arith.subf %54, %55 : vector<16x1xf32>
    %57 = vector.broadcast %49 : vector<16x1xf32> to vector<16x32xf32>
    %58 = arith.subf %45, %57 : vector<16x32xf32>
    %cst_19 = arith.constant 9.99999974E-6 : f32
    %59 = vector.broadcast %cst_19 : f32 to vector<16x1xf32>
    %60 = arith.addf %56, %59 : vector<16x1xf32>
    %61 = math.rsqrt %60 : vector<16x1xf32>
    %62 = vector.broadcast %61 : vector<16x1xf32> to vector<16x32xf32>
    %63 = arith.mulf %58, %62 : vector<16x32xf32>
    %c0_20 = arith.constant 0 : index
    %c0_21 = arith.constant 0 : index
    %64 = vector.load %arg6[%c0_20, %c0_21] : memref<1x32xf32, #tpu.memory_space<vmem>>, vector<1x32xf32>
    %65 = vector.broadcast %64 : vector<1x32xf32> to vector<16x32xf32>
    %66 = arith.mulf %63, %65 : vector<16x32xf32>
    %c0_22 = arith.constant 0 : index
    %c0_23 = arith.constant 0 : index
    %67 = vector.load %arg7[%c0_22, %c0_23] : memref<1x32xf32, #tpu.memory_space<vmem>>, vector<1x32xf32>
    %68 = vector.broadcast %67 : vector<1x32xf32> to vector<16x32xf32>
    %69 = arith.addf %66, %68 : vector<16x32xf32>
    %70 = arith.truncf %69 : vector<16x32xf32> to vector<16x32xbf16>
    %c0_24 = arith.constant 0 : index
    %c0_25 = arith.constant 0 : index
    %71 = vector.load %arg8[%c0_24, %c0_25] : memref<32x64xbf16, #tpu.memory_space<vmem>>, vector<32x64xbf16>
    %cst_26 = arith.constant dense<0.000000e+00> : vector<16x64xf32>
    %72 = tpu.matmul %70, %71, %cst_26 {dimension_numbers = #tpu.dot_dimension_numbers<[1], [0], [0], [1], [0, 0, 1, 1], [], []>} : vector<16x32xbf16>, vector<32x64xbf16>, vector<16x64xf32> -> vector<16x64xf32>
    %c0_27 = arith.constant 0 : index
    %c0_28 = arith.constant 0 : index
    %73 = vector.load %arg9[%c0_27, %c0_28] : memref<1x64xf32, #tpu.memory_space<vmem>>, vector<1x64xf32>
    %74 = vector.broadcast %73 : vector<1x64xf32> to vector<16x64xf32>
    %75 = arith.addf %72, %74 : vector<16x64xf32>
    %cst_29 = arith.constant 5.000000e-01 : f32
    %76 = vector.broadcast %cst_29 : f32 to vector<16x64xf32>
    %77 = arith.mulf %76, %75 : vector<16x64xf32>
    %cst_30 = arith.constant 0.707106769 : f32
    %78 = vector.broadcast %cst_30 : f32 to vector<16x64xf32>
    %79 = arith.mulf %75, %78 : vector<16x64xf32>
    %80 = math.erf %79 : vector<16x64xf32>
    %cst_31 = arith.constant 1.000000e+00 : f32
    %81 = vector.broadcast %cst_31 : f32 to vector<16x64xf32>
    %82 = arith.addf %81, %80 : vector<16x64xf32>
    %83 = arith.mulf %77, %82 : vector<16x64xf32>
    %84 = arith.truncf %83 : vector<16x64xf32> to vector<16x64xbf16>
    %c0_32 = arith.constant 0 : index
    %c0_33 = arith.constant 0 : index
    %85 = vector.load %arg10[%c0_32, %c0_33] : memref<64x32xbf16, #tpu.memory_space<vmem>>, vector<64x32xbf16>
    %cst_34 = arith.constant dense<0.000000e+00> : vector<16x32xf32>
    %86 = tpu.matmul %84, %85, %cst_34 {dimension_numbers = #tpu.dot_dimension_numbers<[1], [0], [0], [1], [0, 0, 1, 1], [], []>} : vector<16x64xbf16>, vector<64x32xbf16>, vector<16x32xf32> -> vector<16x32xf32>
    %c0_35 = arith.constant 0 : index
    %c0_36 = arith.constant 0 : index
    %87 = vector.load %arg11[%c0_35, %c0_36] : memref<1x32xf32, #tpu.memory_space<vmem>>, vector<1x32xf32>
    %88 = vector.broadcast %87 : vector<1x32xf32> to vector<16x32xf32>
    %89 = arith.addf %86, %88 : vector<16x32xf32>
    %90 = arith.addf %89, %69 : vector<16x32xf32>
    %cst_37 = arith.constant dense<0.000000e+00> : vector<16xf32>
    %91 = vector.multi_reduction <add>, %90, %cst_37 [1] : vector<16x32xf32> to vector<16xf32>
    %92 = vector.shape_cast %91 : vector<16xf32> to vector<16x1xf32>
    %cst_38 = arith.constant 3.200000e+01 : f32
    %93 = vector.broadcast %cst_38 : f32 to vector<16x1xf32>
    %94 = arith.divf %92, %93 : vector<16x1xf32>
    %95 = arith.mulf %90, %90 : vector<16x32xf32>
    %cst_39 = arith.constant dense<0.000000e+00> : vector<16xf32>
    %96 = vector.multi_reduction <add>, %95, %cst_39 [1] : vector<16x32xf32> to vector<16xf32>
    %97 = vector.shape_cast %96 : vector<16xf32> to vector<16x1xf32>
    %cst_40 = arith.constant 3.200000e+01 : f32
    %98 = vector.broadcast %cst_40 : f32 to vector<16x1xf32>
    %99 = arith.divf %97, %98 : vector<16x1xf32>
    %100 = arith.mulf %94, %94 : vector<16x1xf32>
    %101 = arith.subf %99, %100 : vector<16x1xf32>
    %102 = vector.broadcast %94 : vector<16x1xf32> to vector<16x32xf32>
    %103 = arith.subf %90, %102 : vector<16x32xf32>
    %cst_41 = arith.constant 9.99999974E-6 : f32
    %104 = vector.broadcast %cst_41 : f32 to vector<16x1xf32>
    %105 = arith.addf %101, %104 : vector<16x1xf32>
    %106 = math.rsqrt %105 : vector<16x1xf32>
    %107 = vector.broadcast %106 : vector<16x1xf32> to vector<16x32xf32>
    %108 = arith.mulf %103, %107 : vector<16x32xf32>
    %c0_42 = arith.constant 0 : index
    %c0_43 = arith.constant 0 : index
    %109 = vector.load %arg12[%c0_42, %c0_43] : memref<1x32xf32, #tpu.memory_space<vmem>>, vector<1x32xf32>
    %110 = vector.broadcast %109 : vector<1x32xf32> to vector<16x32xf32>
    %111 = arith.mulf %108, %110 : vector<16x32xf32>
    %c0_44 = arith.constant 0 : index
    %c0_45 = arith.constant 0 : index
    %112 = vector.load %arg13[%c0_44, %c0_45] : memref<1x32xf32, #tpu.memory_space<vmem>>, vector<1x32xf32>
    %113 = vector.broadcast %112 : vector<1x32xf32> to vector<16x32xf32>
    %114 = arith.addf %111, %113 : vector<16x32xf32>
    %115 = vector.shape_cast %114 : vector<16x32xf32> to vector<2x8x32xf32>
    %c0_46 = arith.constant 0 : index
    %c0_47 = arith.constant 0 : index
    %c0_48 = arith.constant 0 : index
    %116 = vector.load %arg14[%c0_46, %c0_47, %c0_48] : memref<2x8x32xf32, #tpu.memory_space<vmem>>, vector<2x8x32xf32>
    tpu.vector_store %arg14[%c0_46, %c0_47, %c0_48], %115 {strides = array<i32>} : memref<2x8x32xf32, #tpu.memory_space<vmem>>, vector<2x8x32xf32>,
    return
  }
  func.func @transform_0(%arg0: i32) -> (i32, i32, i32) {
    %c0_i32 = arith.constant 0 : i32
    %c0_i32_0 = arith.constant 0 : i32
    %c0_i32_1 = arith.constant 0 : i32
    return %arg0, %c0_i32, %c0_i32_0 : i32, i32, i32
  }
  func.func @transform_1(%arg0: i32) -> (i32, i32) {
    %c0_i32 = arith.constant 0 : i32
    %c0_i32_0 = arith.constant 0 : i32
    %c0_i32_1 = arith.constant 0 : i32
    return %c0_i32, %c0_i32_0 : i32, i32
  }
  func.func @transform_2(%arg0: i32) -> (i32, i32) {
    %c0_i32 = arith.constant 0 : i32
    %c0_i32_0 = arith.constant 0 : i32
    %c0_i32_1 = arith.constant 0 : i32
    return %c0_i32, %c0_i32_0 : i32, i32
  }
  func.func @transform_3(%arg0: i32) -> (i32, i32) {
    %c0_i32 = arith.constant 0 : i32
    %c0_i32_0 = arith.constant 0 : i32
    %c0_i32_1 = arith.constant 0 : i32
    return %c0_i32, %c0_i32_0 : i32, i32
  }
  func.func @transform_4(%arg0: i32) -> (i32, i32) {
    %c0_i32 = arith.constant 0 : i32
    %c0_i32_0 = arith.constant 0 : i32
    %c0_i32_1 = arith.constant 0 : i32
    return %c0_i32, %c0_i32_0 : i32, i32
  }
  func.func @transform_5(%arg0: i32) -> (i32, i32) {
    %c0_i32 = arith.constant 0 : i32
    %c0_i32_0 = arith.constant 0 : i32
    %c0_i32_1 = arith.constant 0 : i32
    return %c0_i32, %c0_i32_0 : i32, i32
  }
  func.func @transform_6(%arg0: i32) -> (i32, i32) {
    %c0_i32 = arith.constant 0 : i32
    %c0_i32_0 = arith.constant 0 : i32
    %c0_i32_1 = arith.constant 0 : i32
    return %c0_i32, %c0_i32_0 : i32, i32
  }
  func.func @transform_7(%arg0: i32) -> (i32, i32) {
    %c0_i32 = arith.constant 0 : i32
    %c0_i32_0 = arith.constant 0 : i32
    %c0_i32_1 = arith.constant 0 : i32
    return %c0_i32, %c0_i32_0 : i32, i32
  }
  func.func @transform_8(%arg0: i32) -> (i32, i32) {
    %c0_i32 = arith.constant 0 : i32
    %c0_i32_0 = arith.constant 0 : i32
    %c0_i32_1 = arith.constant 0 : i32
    return %c0_i32, %c0_i32_0 : i32, i32
  }
  func.func @transform_9(%arg0: i32) -> (i32, i32) {
    %c0_i32 = arith.constant 0 : i32
    %c0_i32_0 = arith.constant 0 : i32
    %c0_i32_1 = arith.constant 0 : i32
    return %c0_i32, %c0_i32_0 : i32, i32
  }
  func.func @transform_10(%arg0: i32) -> (i32, i32) {
    %c0_i32 = arith.constant 0 : i32
    %c0_i32_0 = arith.constant 0 : i32
    %c0_i32_1 = arith.constant 0 : i32
    return %c0_i32, %c0_i32_0 : i32, i32
  }
  func.func @transform_11(%arg0: i32) -> (i32, i32) {
    %c0_i32 = arith.constant 0 : i32
    %c0_i32_0 = arith.constant 0 : i32
    %c0_i32_1 = arith.constant 0 : i32
    return %c0_i32, %c0_i32_0 : i32, i32
  }
  func.func @transform_12(%arg0: i32) -> (i32, i32) {
    %c0_i32 = arith.constant 0 : i32
    %c0_i32_0 = arith.constant 0 : i32
    %c0_i32_1 = arith.constant 0 : i32
    return %c0_i32, %c0_i32_0 : i32, i32
  }
  func.func @transform_13(%arg0: i32) -> (i32, i32, i32) {
    %c0_i32 = arith.constant 0 : i32
    %c0_i32_0 = arith.constant 0 : i32
    %c0_i32_1 = arith.constant 0 : i32
    return %arg0, %c0_i32, %c0_i32_0 : i32, i32, i32
  }
}

</mosaic_0001>

<bundles_post_ra>
// kernel: tpu_custom_call.1
= control target key start
LH: loop header
LB: loop body
LE: loop exit
PB: predicated region body
PF: predicated region fallthrough
CT: control target
= control target key end

     0   :  { %v1961_v1 = vmov 0.0   ;;  %vm1962_vm0 = vmmov 0   ;;  %vm65_vm1 = vcmask 261120   ;;  %s2542_s0 = inlined_call_operand.vmem [shape: f32[2,8,32], index: 0, kind: input, shape index: {}]   ;;  %s2543_s1 = inlined_call_operand.vmem [shape: bf16[32,96], index: 1, kind: input, shape index: {}]   ;;  %s2544_s2 = inlined_call_operand.vmem [shape: f32[32,8], index: 2, kind: input, shape index: {}]   ;;  %s2545_s3 = inlined_call_operand.vmem [shape: f32[8,32], index: 3, kind: input, shape index: {}]   ;;  %s2546_s4 = inlined_call_operand.vmem [shape: bf16[32,32], index: 4, kind: input, shape index: {}]   ;;  %s2547_s5 = inlined_call_operand.vmem [shape: f32[1,32], index: 5, kind: input, shape index: {}]   ;;  %s2548_s6 = inlined_call_operand.vmem [shape: f32[1,32], index: 6, kind: input, shape index: {}]   ;;  %s2549_s7 = inlined_call_operand.vmem [shape: bf16[32,64], index: 7, kind: input, shape index: {}]   ;;  %s2550_s8 = inlined_call_operand.vmem [shape: f32[1,64], index: 8, kind: input, shape index: {}]   ;;  %s2551_s9 = inlined_call_operand.vmem [shape: bf16[64,32], index: 9, kind: input, shape index: {}]   ;;  %s2552_s10 = inlined_call_operand.vmem [shape: f32[1,32], index: 10, kind: input, shape index: {}]   ;;  %s2553_s11 = inlined_call_operand.vmem [shape: f32[1,32], index: 11, kind: input, shape index: {}]   ;;  %s2554_s12 = inlined_call_operand.vmem [shape: f32[1,32], index: 12, kind: input, shape index: {}]   ;;  %s2555_s13 = inlined_call_operand.hbm [shape: f32[2,8,32], index: 13, kind: output, shape index: {}]  }
   0x1   :  { %v1849_v0 = vld [vmem:[%s2543_s1] sm:$0xff]   ;;  %1733 = vmatprep.subr.bf16.mxu0 %v1961_v1  ;;  %v1850_v2 = vld [vmem:[%s2543_s1 + $0x8] sm:$0xff]   ;;  %1737 = vmatprep.mubr.msk.bf16.mxu0 %vm1962_vm0, %v1961_v1  ;;  %s1963_s1 = smov 64  }
   0x2   :  { %1734 = vmatpush3.bf16.msra.mxu0 %v1849_v0  ;;  %v46_v3 = vld [vmem:[%s2542_s0] sm:$0xff]  ;;  %v47_v4 = vld [vmem:[%s2542_s0 + $0x8] sm:$0xff] }
   0x3   :  { %v814_v5 = vld [vmem:[%s2545_s3] sm:$0xff]  ;;  %1735 = vmatprep.subr.bf16.mxu0 %v1961_v1  ;;  %v48_v6 = vpack.c.bf16 %v47_v4, %v46_v3 }
   0x4   :  { %816 = vrot.lane.b32.xlu1 %v814_v5, %s1963_s1 }
   0x6   :  { %1736 = vmatpush3.bf16.msra.mxu0 %v1850_v2 }
   0x7   :  { %1773 = vmatprep.subr.bf16.mxu0 %v1961_v1 }
   0x8   :  { %18 = vsyncpa [#allocation3], 0  ;;  %v312_v7 = vld [vmem:[%s2544_s2] sm:$0xff]  ;;  %v313_v8 = vld [vmem:[%s2544_s2 + $0x8] sm:$0xff]  ;;  %v1964_v13 = vmov 1966171168   ;;  %v116_v15 = vlaneseq }
   0x9   :  { %1738 = vmatmul.mubr.msk.bf16.vlgmr.msra.gmra.mrb[0].mxu0 %vm65_vm1, %v48_v6  ;;  %v314_v9 = vld [vmem:[%s2544_s2 + $0x10] sm:$0xff]  ;;  %v1825_v10 = vpack.c.bf16 %v313_v8, %v312_v7  ;;  %v315_v11 = vld [vmem:[%s2544_s2 + $0x18] sm:$0xff]  ;;  %v114_v14 = vunpack.c.l.s4 %v1964_v13  ;;  %s1965_s25 = smov 96   ;;  %vm509_vm2 = vcmask 64512   ;;  %s1968_s2 = smov 16   ;;  %vm1165_vm3 = vcmask 130048  }
   0xa   :  { %1781 = vmatprep.mubr.msk.bf16.mxu0 %vm1962_vm0, %v1961_v1  ;;  %v1829_v12 = vpack.c.bf16 %v315_v11, %v314_v9  ;;  %v2084_v17 = vshrl.u32 %v116_v15, 7  ;;  %s1969_s26 = smov 8   ;;  %s1970_s27 = smov 24   ;;  %vm1168_vm4 = vcmask 195584   ;;  %vm1173_vm5 = vcmask 326656  }
   0xb   :  { %1826 = vmatprep.subr.bf16.mxu1 %v1825_v10  ;;  %v115_v16 = vunpack.c.0.s8 %v114_v14  ;;  %s1971_s28 = smov 32   ;;  %s1972_s29 = smov 40   ;;  %vm1176_vm6 = vcmask 392192   ;;  %vm1179_vm7 = vcmask 457728   ;;  %vm1208_vm8 = vcmask 523264  }
   0xc   :  { %1828 = vmatpush3.bf16.msra.mxu1 %v1825_v10  ;;  %v2088_v23 = vsub.s32 0, %v2084_v17  ;;  %s1973_s30 = smov 48   ;;  %s1974_s14 = smov 56  }
   0xd   :  { %1830 = vmatprep.subr.bf16.mxu1 %v1829_v12  ;;  %v118_v18 = vsub.s32 %v115_v16, %v2084_v17 }
  0x10   :  { %1832 = vmatpush3.bf16.msra.mxu1 %v1829_v12 }
  0x11   :  { %1797 = vmatprep.subr.bf16.mxu1 %v1961_v1 }
  0x76   :  { %v2091_v39 = vpop.permute.xlu1 %816 }
  0xdc   :  { %v103_v19 = vpop.f32.mrb[0].mxu0 }
  0xdd   :  { %v112_v20 = vcombine.high %v103_v19, %v103_v19  ;;  %v119_v21 = vrot.slane %v103_v19, %v118_v18  ;;  %290 = vrot.lane.b32.xlu0 %v103_v19, %s1965_s25  ;;  %v1739_v22 = vpop.f32.mrb[1].mxu0 }
  0xde   :  { %v106_v24 = vpop.f32.mrb[2].mxu0 }
  0xdf   :  { %v126_v25 = vrot.slane %v112_v20, %v118_v18  ;;  %v127_v26 = vcombine.high %v119_v21, %v119_v21  ;;  %v135_v27 = vrot.slane %v119_v21, %v118_v18  ;;  %v161_v28 = vcombine.high %v106_v24, %v106_v24  ;;  %v1740_v29 = vpop.f32.mrb[3].mxu0 }
  0xe0   :  { %v168_v30 = vrot.slane %v106_v24, %v118_v18 }
  0xe1   :  { %v128_v31 = vcombine.high %v126_v25, %v126_v25  ;;  %v142_v32 = vrot.slane %v126_v25, %v118_v18  ;;  %v149_v33 = vrot.slane %v127_v26, %v118_v18  ;;  %v157_v34 = vcombine.high %v135_v27, %v135_v27  ;;  %292 = vrot.lane.b32.xlu0 %v106_v24, %s1965_s25 }
  0xe2   :  { %v213_v35 = vrot.slane %v135_v27, %v2088_v23  ;;  %v175_v36 = vrot.slane %v161_v28, %v118_v18  ;;  %v176_v37 = vcombine.high %v168_v30, %v168_v30  ;;  %v184_v38 = vrot.slane %v168_v30, %v118_v18 }
  0xe3   :  { %v156_v40 = vrot.slane %v128_v31, %v118_v18  ;;  %v159_v41 = vcombine.high %v149_v33, %v149_v33  ;;  %v217_v42 = vrot.slane %v149_v33, %v2088_v23  ;;  %v158_v47 = vcombine.high %v142_v32, %v142_v32 }
  0xe4   :  { %v177_v43 = vcombine.high %v175_v36, %v175_v36  ;;  %v191_v44 = vrot.slane %v175_v36, %v118_v18  ;;  %v198_v45 = vrot.slane %v176_v37, %v118_v18  ;;  %v206_v46 = vcombine.high %v184_v38, %v184_v38 }
  0xe5   :  { %v819_v48 = vmul.f32 %v2091_v39, %v213_v35  ;;  %v820_v49 = vmul.f32 %v2091_v39, %v217_v42  ;;  %v221_v50 = vrot.slane %v157_v34, %v2088_v23  ;;  %v245_v53 = vrot.slane %v184_v38, %v2088_v23 }
  0xe6   :  { %v205_v51 = vrot.slane %v177_v43, %v118_v18  ;;  %v208_v52 = vcombine.high %v198_v45, %v198_v45  ;;  %v225_v54 = vrot.slane %v159_v41, %v2088_v23  ;;  %v207_v55 = vcombine.high %v191_v44, %v191_v44 }
  0xe7   :  { %v1184_v56 = vpack.c.bf16 %v820_v49, %v819_v48  ;;  %v229_v57 = vrot.slane %v142_v32, %v2088_v23  ;;  %v233_v58 = vrot.slane %v156_v40, %v2088_v23  ;;  %v821_v59 = vmul.f32 %v2091_v39, %v221_v50 }
  0xe8   :  { %v822_v60 = vmul.f32 %v2091_v39, %v225_v54  ;;  %v249_v61 = vrot.slane %v198_v45, %v2088_v23  ;;  %v253_v62 = vrot.slane %v206_v46, %v2088_v23  ;;  %v257_v2 = vrot.slane %v208_v52, %v2088_v23 }
  0xe9   :  { %1196 = vrot.lane.b32.xlu1 %v1184_v56, %s1963_s1  ;;  %v823_v63 = vmul.f32 %v2091_v39, %v229_v57  ;;  %v824_v0 = vmul.f32 %v2091_v39, %v233_v58  ;;  %v160_v3 = vcombine.high %v156_v40, %v156_v40  ;;  %v2113_v9 = vrot.slane %v191_v44, %v2088_v23 }
  0xea   :  { %v1185_v4 = vpack.c.bf16 %v822_v60, %v821_v59  ;;  %v828_v5 = vmul.f32 %v2091_v39, %v249_v61  ;;  %v830_v7 = vmul.f32 %v2091_v39, %v257_v2  ;;  %v827_v10 = vmul.f32 %v2091_v39, %v245_v53 }
  0xeb   :  { %v1186_v6 = vpack.c.bf16 %v824_v0, %v823_v63  ;;  %v241_v8 = vrot.slane %v160_v3, %v2088_v23  ;;  %v237_v11 = vrot.slane %v158_v47, %v2088_v23  ;;  %v2119_v12 = vrot.slane %v205_v51, %v2088_v23 }
  0xec   :  { %1198 = vrot.lane.b32.xlu0 %v1185_v4, %s1963_s1  ;;  %v2122_v13 = vrot.slane %v207_v55, %v2088_v23  ;;  %v829_v14 = vmul.f32 %v2091_v39, %v253_v62  ;;  %v209_v15 = vcombine.high %v205_v51, %v205_v51  ;;  %v1188_v16 = vpack.c.bf16 %v828_v5, %v827_v10 }
  0xed   :  { %1200 = vrot.lane.b32.xlu1 %v1186_v6, %s1963_s1  ;;  %v826_v18 = vmul.f32 %v2091_v39, %v241_v8  ;;  %v825_v21 = vmul.f32 %v2091_v39, %v237_v11 }
  0xee   :  { %v1189_v19 = vpack.c.bf16 %v830_v7, %v829_v14  ;;  %v2128_v20 = vrot.slane %v209_v15, %v2088_v23 }
  0xef   :  { %v1187_v22 = vpack.c.bf16 %v826_v18, %v825_v21 }
  0xf0   :  { %1256 = vrot.lane.b32.xlu0 %v1188_v16, %s1963_s1 }
  0xf1   :  { %1258 = vrot.lane.b32.xlu1 %v1189_v19, %s1963_s1 }
  0xf4   :  { %1202 = vrot.lane.b32.xlu0 %v1187_v22, %s1963_s1 }
 0x14f   :  { %v291_v24 = vpop.permute.xlu0 %290 }
 0x150   :  { %v296_v25 = vmul.f32 %v291_v24, %v213_v35  ;;  %v297_v26 = vmul.f32 %v291_v24, %v217_v42  ;;  %v298_v27 = vmul.f32 %v291_v24, %v221_v50  ;;  %v299_v23 = vmul.f32 %v291_v24, %v225_v54 }
 0x151   :  { %v300_v28 = vmul.f32 %v291_v24, %v229_v57  ;;  %v301_v29 = vmul.f32 %v291_v24, %v233_v58  ;;  %v302_v31 = vmul.f32 %v291_v24, %v237_v11  ;;  %v303_v33 = vmul.f32 %v291_v24, %v241_v8 }
 0x152   :  { %1749 = vmatprep.mubr.msk.f32.mxu1 %vm65_vm1, %v296_v25 }
 0x153   :  { %1750 = vmatmul.mubr.msk.f32.vlgmr.msra.gmra.mrb[0].mxu1 %vm65_vm1, %v297_v26  ;;  %v293_v30 = vpop.permute.xlu0 %292 }
 0x154   :  { %1752 = vmatprep.mubr.msk.f32.mxu1 %vm65_vm1, %v298_v27  ;;  %v304_v35 = vmul.f32 %v293_v30, %v245_v53  ;;  %v305_v36 = vmul.f32 %v293_v30, %v249_v61  ;;  %v306_v38 = vmul.f32 %v293_v30, %v253_v62  ;;  %v307_v41 = vmul.f32 %v293_v30, %v257_v2 }
 0x155   :  { %v308_v42 = vmul.f32 %v293_v30, %v2113_v9  ;;  %v309_v44 = vmul.f32 %v293_v30, %v2119_v12  ;;  %v310_v45 = vmul.f32 %v293_v30, %v2122_v13  ;;  %v311_v46 = vmul.f32 %v293_v30, %v2128_v20 }
 0x156   :  { %v1966_v61 = vmov 1983009808   ;;  %v1967_v2 = vmov 1934713408  }
 0x157   :  { %1753 = vmatmul.mubr.msk.f32.gmra.mrb[2].mxu1 %vm65_vm1, %v299_v23  ;;  %v2172_v62 = vunpack.c.l.s4 %v1966_v61  ;;  %v2174_v3 = vunpack.c.l.s4 %v1967_v2 }
 0x158   :  { %1755 = vmatprep.mubr.msk.f32.mxu1 %vm65_vm1, %v300_v28 }
 0x159   :  { %v839_v19 = vunpack.c.0.s8 %v2172_v62  ;;  %v903_v25 = vunpack.c.0.s8 %v2174_v3 }
 0x15b   :  { %v1197_v32 = vpop.permute.xlu1 %1196  ;;  %1756 = vmatmul.mubr.msk.f32.gmra.mrb[4].mxu1 %vm65_vm1, %v301_v29 }
 0x15c   :  { %1758 = vmatprep.mubr.msk.f32.mxu1 %vm65_vm1, %v302_v31  ;;  %1774 = vmatpush3.bf16.msra.mxu0 %v1197_v32 }
 0x15d   :  { %1775 = vmatprep.subr.bf16.mxu0 %v1961_v1 }
 0x15e   :  { %v1199_v34 = vpop.permute.xlu0 %1198 }
 0x15f   :  { %1759 = vmatmul.mubr.msk.f32.gmra.mrb[6].mxu1 %vm65_vm1, %v303_v33  ;;  %v1201_v40 = vpop.permute.xlu1 %1200 }
 0x160   :  { %1761 = vmatprep.mubr.msk.f32.mxu1 %vm65_vm1, %v304_v35  ;;  %1776 = vmatpush3.bf16.msra.mxu0 %v1199_v34 }
 0x161   :  { %1777 = vmatprep.subr.bf16.mxu0 %v1961_v1 }
 0x162   :  { %v2145_v37 = vpop.permute.xlu0 %1256 }
 0x163   :  { %1762 = vmatmul.mubr.msk.f32.gmra.mrb[8].mxu1 %vm65_vm1, %v305_v36 }
 0x164   :  { %1764 = vmatprep.mubr.msk.f32.mxu1 %vm65_vm1, %v306_v38  ;;  %1778 = vmatpush3.bf16.msra.mxu0 %v1201_v40 }
 0x165   :  { %1779 = vmatprep.subr.bf16.mxu0 %v1961_v1 }
 0x166   :  { %v1203_v43 = vpop.permute.xlu0 %1202 }
 0x167   :  { %1765 = vmatmul.mubr.msk.f32.gmra.mrb[10].mxu1 %vm65_vm1, %v307_v41 }
 0x168   :  { %1767 = vmatprep.mubr.msk.f32.mxu1 %vm65_vm1, %v308_v42  ;;  %1780 = vmatpush3.bf16.msra.mxu0 %v1203_v43 }
 0x169   :  { %1785 = vmatprep.subr.bf16.mxu0 %v1961_v1 }
 0x16b   :  { %1768 = vmatmul.mubr.msk.f32.gmra.mrb[12].mxu1 %vm65_vm1, %v309_v44 }
 0x16c   :  { %1770 = vmatprep.mubr.msk.f32.mxu1 %vm65_vm1, %v310_v45 }
 0x16f   :  { %1771 = vmatmul.mubr.msk.f32.gmra.mrb[14].mxu1 %vm65_vm1, %v311_v46 }
 0x170   :  { %1801 = vmatprep.mubr.msk.bf16.mxu1 %vm1962_vm0, %v1961_v1 }
 0x226   :  { %v1751_v47 = vpop.f32.mrb[0].mxu1 }
 0x227   :  { %v517_v48 = vsel %vm509_vm2, %v1751_v47, -inf  ;;  %v430_v49 = vpop.f32.mrb[1].mxu1 }
 0x228   :  { %v518_v50 = vrot.slane %v517_v48, 4  ;;  %v510_v51 = vsel %vm509_vm2, %v430_v49, -inf }
 0x229   :  { %v511_v52 = vrot.slane %v510_v51, 4 }
 0x22a   :  { %v519_v53 = vmax.f32 %v517_v48, %v518_v50  ;;  %v2164_v54 = vpop.f32.mrb[2].mxu1 }
 0x22b   :  { %v512_v55 = vmax.f32 %v510_v51, %v511_v52  ;;  %v531_v56 = vsel %vm509_vm2, %v2164_v54, -inf  ;;  %v2168_v57 = vpop.f32.mrb[3].mxu1 }
 0x22c   :  { %v520_v58 = vrot.slane %v519_v53, 2  ;;  %v532_v59 = vrot.slane %v531_v56, 4  ;;  %v524_v60 = vsel %vm509_vm2, %v2168_v57, -inf }
 0x22d   :  { %v513_v63 = vrot.slane %v512_v55, 2  ;;  %v525_v0 = vrot.slane %v524_v60, 4 }
 0x22e   :  { %v521_v4 = vmax.f32 %v519_v53, %v520_v58  ;;  %v533_v5 = vmax.f32 %v531_v56, %v532_v59  ;;  %v2176_v6 = vpop.f32.mrb[4].mxu1 }
 0x22f   :  { %v514_v7 = vmax.f32 %v512_v55, %v513_v63  ;;  %v526_v8 = vmax.f32 %v524_v60, %v525_v0  ;;  %v545_v10 = vsel %vm509_vm2, %v2176_v6, -inf  ;;  %v2180_v11 = vpop.f32.mrb[5].mxu1 }
 0x230   :  { %v522_v14 = vrot.slane %v521_v4, 1  ;;  %v534_v15 = vrot.slane %v533_v5, 2  ;;  %v546_v16 = vrot.slane %v545_v10, 4  ;;  %v538_v18 = vsel %vm509_vm2, %v2180_v11, -inf }
 0x231   :  { %v515_v21 = vrot.slane %v514_v7, 1  ;;  %v527_v22 = vrot.slane %v526_v8, 2  ;;  %v539_v24 = vrot.slane %v538_v18, 4 }
 0x232   :  { %v523_v26 = vmax.f32 %v521_v4, %v522_v14  ;;  %v535_v27 = vmax.f32 %v533_v5, %v534_v15  ;;  %v547_v23 = vmax.f32 %v545_v10, %v546_v16  ;;  %v2186_v28 = vpop.f32.mrb[6].mxu1 }
 0x233   :  { %v516_v29 = vmax.f32 %v514_v7, %v515_v21  ;;  %v528_v30 = vmax.f32 %v526_v8, %v527_v22  ;;  %v540_v31 = vmax.f32 %v538_v18, %v539_v24  ;;  %v559_v32 = vsel %vm509_vm2, %v2186_v28, -inf  ;;  %v2190_v33 = vpop.f32.mrb[7].mxu1 }
 0x234   :  { %v623_v34 = vsub.f32 %v1751_v47, %v523_v26  ;;  %v536_v35 = vrot.slane %v535_v27, 1  ;;  %v548_v36 = vrot.slane %v547_v23, 2  ;;  %v560_v38 = vrot.slane %v559_v32, 4 }
 0x235   :  { %v622_v40 = vsub.f32 %v430_v49, %v516_v29  ;;  %v529_v41 = vrot.slane %v528_v30, 1  ;;  %v541_v42 = vrot.slane %v540_v31, 2  ;;  %v552_v43 = vsel %vm509_vm2, %v2190_v33, -inf }
 0x236   :  { %v640_v44 = vmul.f32 1.442695, %v623_v34  ;;  %v537_v45 = vmax.f32 %v535_v27, %v536_v35  ;;  %v549_v46 = vmax.f32 %v547_v23, %v548_v36  ;;  %v561_v48 = vmax.f32 %v559_v32, %v560_v38  ;;  %v2194_v50 = vpop.f32.mrb[8].mxu1 }
 0x237   :  { %v638_v51 = vmul.f32 1.442695, %v622_v40  ;;  %v530_v52 = vmax.f32 %v528_v30, %v529_v41  ;;  %v542_v53 = vmax.f32 %v540_v31, %v541_v42  ;;  %v553_v55 = vrot.slane %v552_v43, 4  ;;  %v2196_v47 = vpop.f32.mrb[9].mxu1 }
 0x238   :  { %1859 = vpow2.f32 %v640_v44  ;;  %v625_v49 = vsub.f32 %v2164_v54, %v537_v45  ;;  %v550_v56 = vrot.slane %v549_v46, 1  ;;  %v562_v58 = vrot.slane %v561_v48, 2 }
 0x239   :  { %1861 = vpow2.f32 %v638_v51  ;;  %v624_v59 = vsub.f32 %v2168_v57, %v530_v52  ;;  %v543_v60 = vrot.slane %v542_v53, 1  ;;  %v554_v61 = vmax.f32 %v552_v43, %v553_v55 }
 0x23a   :  { %v644_v63 = vmul.f32 1.442695, %v625_v49  ;;  %v551_v0 = vmax.f32 %v549_v46, %v550_v56  ;;  %v563_v2 = vmax.f32 %v561_v48, %v562_v58  ;;  %v573_v4 = vsel %vm509_vm2, %v2194_v50, -inf  ;;  %v2202_v5 = vpop.f32.mrb[10].mxu1 }
 0x23b   :  { %v642_v7 = vmul.f32 1.442695, %v624_v59  ;;  %v544_v8 = vmax.f32 %v542_v53, %v543_v60  ;;  %v555_v10 = vrot.slane %v554_v61, 2  ;;  %v574_v14 = vrot.slane %v573_v4, 4  ;;  %v2204_v54 = vpop.f32.mrb[11].mxu1 }
 0x23c   :  { %1863 = vpow2.f32 %v644_v63  ;;  %v627_v15 = vsub.f32 %v2176_v6, %v551_v0  ;;  %v564_v57 = vrot.slane %v563_v2, 1  ;;  %v566_v16 = vsel %vm509_vm2, %v2196_v47, -inf }
 0x23d   :  { %1865 = vpow2.f32 %v642_v7  ;;  %v626_v18 = vsub.f32 %v2180_v11, %v544_v8  ;;  %v556_v21 = vmax.f32 %v554_v61, %v555_v10  ;;  %v575_v22 = vmax.f32 %v573_v4, %v574_v14 }
 0x23e   :  { %v648_v24 = vmul.f32 1.442695, %v627_v15  ;;  %v565_v26 = vmax.f32 %v563_v2, %v564_v57  ;;  %v567_v27 = vrot.slane %v566_v16, 4  ;;  %v587_v23 = vsel %vm509_vm2, %v2202_v5, -inf  ;;  %v2212_v29 = vpop.f32.mrb[12].mxu1 }
 0x23f   :  { %v646_v30 = vmul.f32 1.442695, %v626_v18  ;;  %v557_v31 = vrot.slane %v556_v21, 1  ;;  %v576_v6 = vrot.slane %v575_v22, 2  ;;  %v588_v32 = vrot.slane %v587_v23, 4  ;;  %v2214_v34 = vpop.f32.mrb[13].mxu1 }
 0x240   :  { %1867 = vpow2.f32 %v648_v24  ;;  %v629_v35 = vsub.f32 %v2186_v28, %v565_v26  ;;  %v568_v11 = vmax.f32 %v566_v16, %v567_v27  ;;  %v580_v36 = vsel %vm509_vm2, %v2204_v54, -inf }
 0x241   :  { %1869 = vpow2.f32 %v646_v30  ;;  %v558_v38 = vmax.f32 %v556_v21, %v557_v31  ;;  %v577_v40 = vmax.f32 %v575_v22, %v576_v6  ;;  %v589_v41 = vmax.f32 %v587_v23, %v588_v32 }
 0x242   :  { %v2219_v42 = vpop.eup %1859  ;;  %v652_v43 = vmul.f32 1.442695, %v629_v35  ;;  %v569_v44 = vrot.slane %v568_v11, 2  ;;  %v581_v45 = vrot.slane %v580_v36, 4  ;;  %v2223_v46 = vsel %vm509_vm2, %v2212_v29, -inf  ;;  %v2225_v48 = vpop.f32.mrb[14].mxu1 }
 0x243   :  { %v2227_v28 = vpop.eup %1861  ;;  %v677_v51 = vsel %vm509_vm2, %v2219_v42, 0.0  ;;  %v628_v52 = vsub.f32 %v2190_v33, %v558_v38  ;;  %v578_v53 = vrot.slane %v577_v40, 1  ;;  %v590_v55 = vrot.slane %v589_v41, 2  ;;  %v2232_v49 = vpop.f32.mrb[15].mxu1 }
 0x244   :  { %v678_v56 = vrot.slane %v677_v51, 4  ;;  %v670_v58 = vsel %vm509_vm2, %v2227_v28, 0.0  ;;  %1871 = vpow2.f32 %v652_v43  ;;  %v570_v59 = vmax.f32 %v568_v11, %v569_v44 }
 0x245   :  { %v671_v60 = vrot.slane %v670_v58, 4  ;;  %v650_v61 = vmul.f32 1.442695, %v628_v52  ;;  %v579_v63 = vmax.f32 %v577_v40, %v578_v53  ;;  %v591_v0 = vmax.f32 %v589_v41, %v590_v55 }
 0x246   :  { %v2236_v2 = vpop.eup %1863  ;;  %v679_v4 = vadd.f32 %v678_v56, %v677_v51  ;;  %v571_v7 = vrot.slane %v570_v59, 1  ;;  %v2238_v8 = vmax.f32 %v580_v36, %v581_v45  ;;  %v602_v33 = vrot.slane %v2223_v46, 4 }
 0x247   :  { %v2241_v10 = vpop.eup %1865  ;;  %v672_v14 = vadd.f32 %v671_v60, %v670_v58  ;;  %v691_v15 = vsel %vm509_vm2, %v2236_v2, 0.0  ;;  %1873 = vpow2.f32 %v650_v61  ;;  %v631_v57 = vsub.f32 %v2194_v50, %v579_v63 }
 0x248   :  { %v680_v16 = vrot.slane %v679_v4, 2  ;;  %v692_v18 = vrot.slane %v691_v15, 4  ;;  %v684_v21 = vsel %vm509_vm2, %v2241_v10, 0.0  ;;  %v572_v22 = vmax.f32 %v570_v59, %v571_v7 }
 0x249   :  { %v673_v24 = vrot.slane %v672_v14, 2  ;;  %v685_v26 = vrot.slane %v684_v21, 4  ;;  %v656_v27 = vmul.f32 1.442695, %v631_v57  ;;  %v592_v23 = vrot.slane %v591_v0, 1 }
 0x24a   :  { %v2248_v30 = vpop.eup %1867  ;;  %v681_v31 = vadd.f32 %v680_v16, %v679_v4  ;;  %v693_v6 = vadd.f32 %v692_v18, %v691_v15  ;;  %v630_v32 = vsub.f32 %v2196_v47, %v572_v22  ;;  %v583_v35 = vrot.slane %v2238_v8, 2 }
 0x24b   :  { %v2252_v11 = vpop.eup %1869  ;;  %v674_v50 = vadd.f32 %v673_v24, %v672_v14  ;;  %v686_v36 = vadd.f32 %v685_v26, %v684_v21  ;;  %v705_v38 = vsel %vm509_vm2, %v2248_v30, 0.0  ;;  %1875 = vpow2.f32 %v656_v27 }
 0x24c   :  { %v682_v40 = vrot.slane %v681_v31, 1  ;;  %v694_v41 = vrot.slane %v693_v6, 2  ;;  %v706_v43 = vrot.slane %v705_v38, 4  ;;  %v698_v44 = vsel %vm509_vm2, %v2252_v11, 0.0 }
 0x24d   :  { %v675_v45 = vrot.slane %v674_v50, 1  ;;  %v687_v51 = vrot.slane %v686_v36, 2  ;;  %v699_v52 = vrot.slane %v698_v44, 4  ;;  %v654_v47 = vmul.f32 1.442695, %v630_v32 }
 0x24e   :  { %v2258_v53 = vpop.eup %1871  ;;  %v683_v55 = vadd.f32 %v682_v40, %v681_v31  ;;  %v695_v56 = vadd.f32 %v694_v41, %v693_v6  ;;  %v707_v58 = vadd.f32 %v706_v43, %v705_v38  ;;  %v593_v59 = vmax.f32 %v591_v0, %v592_v23 }
 0x24f   :  { %v676_v60 = vadd.f32 %v675_v45, %v674_v50  ;;  %v688_v61 = vadd.f32 %v687_v51, %v686_v36  ;;  %v700_v63 = vadd.f32 %v699_v52, %v698_v44  ;;  %v719_v4 = vsel %vm509_vm2, %v2258_v53, 0.0 }
 0x250   :  { %1877 = vrcp.f32 %v683_v55  ;;  %v696_v7 = vrot.slane %v695_v56, 1  ;;  %v708_v14 = vrot.slane %v707_v58, 2  ;;  %v720_v15 = vrot.slane %v719_v4, 4 }
 0x251   :  { %v2262_v57 = vpop.eup %1873  ;;  %1879 = vrcp.f32 %v676_v60  ;;  %v689_v16 = vrot.slane %v688_v61, 1  ;;  %v701_v18 = vrot.slane %v700_v63, 2  ;;  %v633_v21 = vsub.f32 %v2202_v5, %v593_v59 }
 0x252   :  { %v697_v22 = vadd.f32 %v696_v7, %v695_v56  ;;  %v709_v24 = vadd.f32 %v708_v14, %v707_v58  ;;  %v721_v0 = vadd.f32 %v720_v15, %v719_v4  ;;  %v712_v26 = vsel %vm509_vm2, %v2262_v57, 0.0 }
 0x253   :  { %v690_v27 = vadd.f32 %v689_v16, %v688_v61  ;;  %v702_v23 = vadd.f32 %v701_v18, %v700_v63  ;;  %v713_v31 = vrot.slane %v712_v26, 4  ;;  %1881 = vpow2.f32 %v654_v47 }
 0x254   :  { %1883 = vrcp.f32 %v697_v22  ;;  %v710_v6 = vrot.slane %v709_v24, 1  ;;  %v722_v32 = vrot.slane %v721_v0, 2  ;;  %v660_v50 = vmul.f32 1.442695, %v633_v21 }
 0x255   :  { %v2267_v36 = vpop.eup %1875  ;;  %1885 = vrcp.f32 %v690_v27  ;;  %v703_v38 = vrot.slane %v702_v23, 1  ;;  %v714_v40 = vadd.f32 %v713_v31, %v712_v26  ;;  %v584_v5 = vmax.f32 %v2238_v8, %v583_v35 }
 0x256   :  { %v711_v41 = vadd.f32 %v710_v6, %v709_v24  ;;  %v723_v43 = vadd.f32 %v722_v32, %v721_v0  ;;  %v733_v44 = vsel %vm509_vm2, %v2267_v36, 0.0  ;;  %1887 = vpow2.f32 %v660_v50 }
 0x257   :  { %v704_v45 = vadd.f32 %v703_v38, %v702_v23  ;;  %v715_v51 = vrot.slane %v714_v40, 2  ;;  %v734_v52 = vrot.slane %v733_v44, 4  ;;  %v585_v47 = vrot.slane %v584_v5, 1 }
 0x258   :  { %1889 = vrcp.f32 %v711_v41  ;;  %v724_v55 = vrot.slane %v723_v43, 1  ;;  %v603_v56 = vmax.f32 %v2223_v46, %v602_v33  ;;  %v594_v58 = vsel %vm509_vm2, %v2214_v34, -inf }
 0x259   :  { %1891 = vrcp.f32 %v704_v45  ;;  %v716_v8 = vadd.f32 %v715_v51, %v714_v40  ;;  %v735_v35 = vadd.f32 %v734_v52, %v733_v44  ;;  %v586_v59 = vmax.f32 %v584_v5, %v585_v47 }
 0x25a   :  { %v1878_v60 = vpop.eup %1877  ;;  %v725_v61 = vadd.f32 %v724_v55, %v723_v43  ;;  %v604_v63 = vrot.slane %v603_v56, 2  ;;  %v595_v4 = vrot.slane %v594_v58, 4  ;;  %v615_v7 = vsel %vm509_vm2, %v2225_v48, -inf }
 0x25b   :  { %v1880_v14 = vpop.eup %1879  ;;  %v2282_v15 = vsub.s32 %v839_v19, %v2084_v17  ;;  %v717_v46 = vrot.slane %v716_v8, 1  ;;  %v736_v33 = vrot.slane %v735_v35, 2  ;;  %v632_v16 = vsub.f32 %v2204_v54, %v586_v59 }
 0x25c   :  { %v2288_v18 = vsub.s32 %v903_v25, %v2084_v17  ;;  %1893 = vrcp.f32 %v725_v61  ;;  %v605_v21 = vmax.f32 %v603_v56, %v604_v63  ;;  %v596_v22 = vmax.f32 %v594_v58, %v595_v4 }
 0x25d   :  { %v2290_v24 = vpop.eup %1881  ;;  %v718_v0 = vadd.f32 %v717_v46, %v716_v8  ;;  %v737_v26 = vadd.f32 %v736_v33, %v735_v35  ;;  %v658_v27 = vmul.f32 1.442695, %v632_v16  ;;  %v616_v62 = vrot.slane %v615_v7, 4 }
 0x25e   :  { %v1884_v19 = vpop.eup %1883  ;;  %v2293_v23 = vmul.f32 %v1878_v60, %v2219_v42  ;;  %v726_v54 = vsel %vm509_vm2, %v2290_v24, 0.0  ;;  %v606_v31 = vrot.slane %v605_v21, 1  ;;  %v597_v3 = vrot.slane %v596_v22, 2 }
 0x25f   :  { %v1886_v17 = vpop.eup %1885  ;;  %1895 = vrcp.f32 %v718_v0  ;;  %v738_v25 = vrot.slane %v737_v26, 1  ;;  %v727_v6 = vrot.slane %v726_v54, 4  ;;  %v608_v32 = vsel %vm509_vm2, %v2232_v49, -inf }
 0x260   :  { %v2299_v50 = vpop.eup %1887  ;;  %v2302_v38 = vmul.f32 %v1884_v19, %v2236_v2  ;;  %1897 = vpow2.f32 %v658_v27  ;;  %v607_v42 = vmax.f32 %v605_v21, %v606_v31  ;;  %v598_v40 = vmax.f32 %v596_v22, %v597_v3 }
 0x261   :  { %v2305_v5 = vmul.f32 %v1886_v17, %v2241_v10  ;;  %v728_v41 = vadd.f32 %v727_v6, %v726_v54  ;;  %v747_v43 = vsel %vm509_vm2, %v2299_v50, 0.0  ;;  %v617_v44 = vmax.f32 %v615_v7, %v616_v62 }
 0x262   :  { %v1890_v45 = vpop.eup %1889  ;;  %v748_v51 = vrot.slane %v747_v43, 4  ;;  %v635_v52 = vsub.f32 %v2212_v29, %v607_v42  ;;  %v599_v47 = vrot.slane %v598_v40, 1  ;;  %v609_v55 = vrot.slane %v608_v32, 4 }
 0x263   :  { %v1892_v56 = vpop.eup %1891  ;;  %v2311_v2 = vmul.f32 %v1880_v14, %v2227_v28  ;;  %v739_v58 = vadd.f32 %v738_v25, %v737_v26  ;;  %v729_v8 = vrot.slane %v728_v41, 2  ;;  %v618_v35 = vrot.slane %v617_v44, 2 }
 0x264   :  { %v2314_v10 = vmul.f32 %v1890_v45, %v2248_v30  ;;  %v749_v59 = vadd.f32 %v748_v51, %v747_v43  ;;  %v664_v60 = vmul.f32 1.442695, %v635_v52  ;;  %v600_v61 = vmax.f32 %v598_v40, %v599_v47 }
 0x265   :  { %v730_v63 = vadd.f32 %v729_v8, %v728_v41  ;;  %v619_v4 = vmax.f32 %v617_v44, %v618_v35  ;;  %v610_v7 = vmax.f32 %v608_v32, %v609_v55  ;;  %v835_v29 = vcombine.low %v2311_v2, %v2305_v5 }
 0x266   :  { %v1894_v46 = vpop.eup %1893  ;;  %v750_v33 = vrot.slane %v749_v59, 2  ;;  %1899 = vpow2.f32 %v664_v60  ;;  %v634_v28 = vsub.f32 %v2214_v34, %v600_v61  ;;  %v851_v14 = vcombine.low %v2293_v23, %v2302_v38 }
 0x267   :  { %v802_v30 = vmul.f32 %v1892_v56, %v2252_v11  ;;  %v2323_v16 = vmul.f32 %v1894_v46, %v2258_v53  ;;  %v620_v21 = vrot.slane %v619_v4, 1  ;;  %v611_v22 = vrot.slane %v610_v7, 2 }
 0x268   :  { %v751_v0 = vadd.f32 %v750_v33, %v749_v59  ;;  %v662_v26 = vmul.f32 1.442695, %v634_v28  ;;  %v843_v27 = vrot.slane %v835_v29, %v2282_v15  ;;  %v859_v62 = vrot.slane %v851_v14, %v2282_v15 }
 0x269   :  { %v1896_v19 = vpop.eup %1895  ;;  %v731_v54 = vrot.slane %v730_v63, 1  ;;  %v621_v31 = vmax.f32 %v619_v4, %v620_v21  ;;  %v612_v34 = vmax.f32 %v610_v7, %v611_v22  ;;  %v883_v3 = vcombine.low %v2314_v10, %v2323_v16 }
 0x26a   :  { %v2329_v17 = vpop.eup %1897  ;;  %v804_v11 = vmul.f32 %v1896_v19, %v2262_v57  ;;  %v752_v53 = vrot.slane %v751_v0, 1  ;;  %1901 = vpow2.f32 %v662_v26  ;;  %v900_v25 = vcombine.high %v843_v27, %v859_v62 }
 0x26b   :  { %1903 = vrcp.f32 %v739_v58  ;;  %v740_v6 = vsel %vm509_vm2, %v2329_v17, 0.0  ;;  %v637_v32 = vsub.f32 %v2225_v48, %v621_v31  ;;  %v613_v42 = vrot.slane %v612_v34, 1 }
 0x26c   :  { %v753_v40 = vadd.f32 %v752_v53, %v751_v0  ;;  %v741_v41 = vrot.slane %v740_v6, 4  ;;  %v867_v43 = vcombine.low %v802_v30, %v804_v11  ;;  %v891_v44 = vrot.slane %v883_v3, %v2282_v15 }
 0x26d   :  { %v668_v45 = vmul.f32 1.442695, %v637_v32  ;;  %v614_v51 = vmax.f32 %v612_v34, %v613_v42  ;;  %v2337_v52 = vrot.slane %v900_v25, %v2288_v18  ;;  %v899_v57 = vcombine.low %v843_v27, %v859_v62 }
 0x26e   :  { %v732_v47 = vadd.f32 %v731_v54, %v730_v63  ;;  %1905 = vrcp.f32 %v753_v40  ;;  %v742_v55 = vadd.f32 %v741_v41, %v740_v6  ;;  %v875_v56 = vrot.slane %v867_v43, %v2282_v15 }
 0x26f   :  { %1907 = vpow2.f32 %v668_v45  ;;  %v636_v48 = vsub.f32 %v2232_v49, %v614_v51  ;;  %v2342_v58 = vrot.slane %v899_v57, %v2288_v18  ;;  %v836_v8 = vcombine.high %v2311_v2, %v2305_v5 }
 0x270   :  { %v2346_v35 = vpop.eup %1899  ;;  %v743_v59 = vrot.slane %v742_v55, 2  ;;  %v932_v60 = vcombine.high %v875_v56, %v891_v44  ;;  %v931_v61 = vcombine.low %v875_v56, %v891_v44  ;;  %v852_v63 = vcombine.high %v2293_v23, %v2302_v38 }
 0x271   :  { %v761_v4 = vsel %vm509_vm2, %v2346_v35, 0.0  ;;  %v666_v7 = vmul.f32 1.442695, %v636_v48  ;;  %v850_v49 = vrot.slane %v836_v8, %v2282_v15  ;;  %v868_v29 = vcombine.high %v802_v30, %v804_v11 }
 0x272   :  { %v744_v46 = vadd.f32 %v743_v59, %v742_v55  ;;  %v762_v33 = vrot.slane %v761_v4, 4  ;;  %v946_v28 = vrot.slane %v932_v60, %v2288_v18  ;;  %v2355_v5 = vrot.slane %v931_v61, %v2288_v18 }
 0x273   :  { %1909 = vpow2.f32 %v666_v7  ;;  %v866_v2 = vrot.slane %v852_v63, %v2282_v15  ;;  %v882_v14 = vrot.slane %v868_v29, %v2282_v15  ;;  %v884_v23 = vcombine.high %v2314_v10, %v2323_v16 }
 0x274   :  { %v2361_v38 = vpop.eup %1901  ;;  %v745_v21 = vrot.slane %v744_v46, 1  ;;  %v763_v22 = vadd.f32 %v762_v33, %v761_v4  ;;  %v965_v30 = vcombine.low %v2337_v52, %v946_v28  ;;  %v964_v0 = vcombine.high %v2342_v58, %v2355_v5 }
 0x275   :  { %v1904_v26 = vpop.eup %1903  ;;  %v754_v27 = vsel %vm509_vm2, %v2361_v38, 0.0  ;;  %v966_v62 = vcombine.high %v2337_v52, %v946_v28  ;;  %v898_v19 = vrot.slane %v884_v23, %v2282_v15  ;;  %v915_v54 = vcombine.low %v850_v49, %v866_v2 }
 0x276   :  { %1911 = vrcp.f32 %v732_v47  ;;  %v746_v10 = vadd.f32 %v745_v21, %v744_v46  ;;  %v764_v16 = vrot.slane %v763_v22, 2  ;;  %v755_v31 = vrot.slane %v754_v27, 4  ;;  %1117 = vrot.lane.b32.xlu0 %v965_v30, %s1968_s2  ;;  %1109 = vrot.lane.b32.xlu1 %v964_v0, %s1969_s26 }
 0x277   :  { %v923_v34 = vrot.slane %v915_v54, %v2288_v18  ;;  %v947_v3 = vcombine.low %v882_v14, %v898_v19  ;;  %v916_v11 = vcombine.high %v850_v49, %v866_v2  ;;  %v948_v53 = vcombine.high %v882_v14, %v898_v19 }
 0x278   :  { %v1906_v25 = vpop.eup %1905  ;;  %1913 = vrcp.f32 %v746_v10  ;;  %v765_v6 = vadd.f32 %v764_v16, %v763_v22  ;;  %v756_v32 = vadd.f32 %v755_v31, %v754_v27  ;;  %v963_v42 = vcombine.low %v2342_v58, %v2355_v5 }
 0x279   :  { %v2375_v40 = vpop.eup %1907  ;;  %v809_v41 = vmul.f32 %v1906_v25, %v2299_v50  ;;  %v955_v43 = vrot.slane %v947_v3, %v2288_v18  ;;  %v930_v44 = vrot.slane %v916_v11, %v2288_v18  ;;  %v962_v45 = vrot.slane %v948_v53, %v2288_v18 }
 0x27a   :  { %v807_v51 = vmul.f32 %v1904_v26, %v2267_v36  ;;  %v757_v52 = vrot.slane %v756_v32, 2  ;;  %v775_v57 = vsel %vm509_vm2, %v2375_v40, 0.0  ;;  %1125 = vrot.lane.b32.xlu0 %v966_v62, %s1970_s27  ;;  %v766_v50 = vrot.slane %v765_v6, 1 }
 0x27b   :  { %v776_v47 = vrot.slane %v775_v57, 4  ;;  %v967_v55 = vcombine.low %v923_v34, %v955_v43  ;;  %v968_v56 = vcombine.high %v923_v34, %v955_v43  ;;  %v969_v48 = vcombine.low %v930_v44, %v962_v45 }
 0x27c   :  { %v758_v8 = vadd.f32 %v757_v52, %v756_v32  ;;  %v970_v59 = vcombine.high %v930_v44, %v962_v45  ;;  %v987_v60 = vcombine.low %v807_v51, %v809_v41  ;;  %v988_v36 = vcombine.high %v807_v51, %v809_v41 }
 0x27d   :  { %v1910_v61 = vpop.eup %1909  ;;  %v777_v63 = vadd.f32 %v776_v47, %v775_v57  ;;  %1133 = vrot.lane.b32.xlu1 %v967_v55, %s1971_s28  ;;  %v767_v28 = vadd.f32 %v766_v50, %v765_v6  ;;  %v832_v22 = vmul.f32 %v2091_v39, %v2119_v12  ;;  %v831_v19 = vmul.f32 %v2091_v39, %v2113_v9 }
 0x27e   :  { %v768_v4 = vsel %vm509_vm2, %v1910_v61, 0.0  ;;  %1141 = vrot.lane.b32.xlu0 %v968_v56, %s1972_s29  ;;  %v995_v7 = vrot.slane %v987_v60, %v2282_v15  ;;  %v1002_v46 = vrot.slane %v988_v36, %v2282_v15  ;;  %v759_v2 = vrot.slane %v758_v8, 1 }
 0x27f   :  { %v778_v49 = vrot.slane %v777_v63, 2  ;;  %v769_v29 = vrot.slane %v768_v4, 4  ;;  %1915 = vrcp.f32 %v767_v28  ;;  %v1190_v34 = vpack.c.bf16 %v832_v22, %v831_v19 }
 0x280   :  { %v1912_v33 = vpop.eup %1911  ;;  %v760_v62 = vadd.f32 %v759_v2, %v758_v8 }
 0x281   :  { %v779_v14 = vadd.f32 %v778_v49, %v777_v63  ;;  %v770_v23 = vadd.f32 %v769_v29, %v768_v4  ;;  %1149 = vrot.lane.b32.xlu1 %v969_v48, %s1973_s30  ;;  %v806_v30 = vmul.f32 %v1912_v33, %v2290_v24 }
 0x282   :  { %v1914_v21 = vpop.eup %1913 }
 0x283   :  { %v808_v0 = vmul.f32 %v1914_v21, %v2329_v17  ;;  %v780_v26 = vrot.slane %v779_v14, 1  ;;  %v771_v27 = vrot.slane %v770_v23, 2 }
 0x285   :  { %v781_v54 = vadd.f32 %v780_v26, %v779_v14  ;;  %v772_v10 = vadd.f32 %v771_v27, %v770_v23  ;;  %1157 = vrot.lane.b32.xlu1 %v970_v59, %s1974_s14  ;;  %v971_v16 = vcombine.low %v806_v30, %v808_v0  ;;  %v972_v31 = vcombine.high %v806_v30, %v808_v0  ;;  %v1259_v27 = vpop.permute.xlu1 %1258 }
 0x286   :  { %v834_v30 = vmul.f32 %v2091_v39, %v2128_v20  ;;  %v833_v0 = vmul.f32 %v2091_v39, %v2122_v13 }
 0x287   :  { %1917 = vrcp.f32 %v781_v54  ;;  %v773_v12 = vrot.slane %v772_v10, 1  ;;  %v979_v24 = vrot.slane %v971_v16, %v2282_v15  ;;  %v986_v17 = vrot.slane %v972_v31, %v2282_v15 }
 0x288   :  { %1919 = vrcp.f32 %v760_v62  ;;  %v1191_v26 = vpack.c.bf16 %v834_v30, %v833_v0 }
 0x289   :  { %v774_v3 = vadd.f32 %v773_v12, %v772_v10  ;;  %1260 = vrot.lane.b32.xlu1 %v1190_v34, %s1963_s1  ;;  %v1035_v11 = vcombine.low %v979_v24, %v995_v7  ;;  %v1036_v9 = vcombine.high %v979_v24, %v995_v7  ;;  %v1051_v53 = vcombine.low %v986_v17, %v1002_v46  ;;  %v1916_v44 = vpop.eup %1915 }
 0x28a   :  { %v1052_v25 = vcombine.high %v986_v17, %v1002_v46  ;;  %v811_v51 = vmul.f32 %v1916_v44, %v2346_v35 }
 0x28b   :  { %1921 = vrcp.f32 %v774_v3  ;;  %v2402_v6 = vrot.slane %v1035_v11, %v2288_v18  ;;  %v1050_v32 = vrot.slane %v1036_v9, %v2288_v18  ;;  %v1059_v41 = vrot.slane %v1051_v53, %v2288_v18 }
 0x28c   :  { %v1066_v43 = vrot.slane %v1052_v25, %v2288_v18 }
 0x291   :  { %v1918_v45 = vpop.eup %1917 }
 0x292   :  { %v813_v52 = vmul.f32 %v1918_v45, %v2375_v40  ;;  %v1920_v57 = vpop.eup %1919 }
 0x293   :  { %v810_v48 = vmul.f32 %v1920_v57, %v2361_v38 }
 0x294   :  { %v1019_v47 = vcombine.low %v811_v51, %v813_v52  ;;  %v1020_v55 = vcombine.high %v811_v51, %v813_v52 }
 0x295   :  { %v1922_v56 = vpop.eup %1921 }
 0x296   :  { %v812_v50 = vmul.f32 %v1922_v56, %v1910_v61  ;;  %v1027_v8 = vrot.slane %v1019_v47, %v2282_v15  ;;  %v1034_v59 = vrot.slane %v1020_v55, %v2282_v15  ;;  %v1852_v55 = vld [vmem:[%s2546_s4 + $0x8] sm:$0xff]  }
 0x298   :  { %v1003_v60 = vcombine.low %v810_v48, %v812_v50  ;;  %v1004_v63 = vcombine.high %v810_v48, %v812_v50 }
 0x29a   :  { %v1011_v36 = vrot.slane %v1003_v60, %v2282_v15  ;;  %v1018_v4 = vrot.slane %v1004_v63, %v2282_v15 }
 0x29c   :  { %v1067_v35 = vcombine.low %v1011_v36, %v1027_v8  ;;  %v1068_v7 = vcombine.high %v1011_v36, %v1027_v8  ;;  %v1083_v40 = vcombine.low %v1018_v4, %v1034_v59  ;;  %v1084_v49 = vcombine.high %v1018_v4, %v1034_v59 }
 0x29e   :  { %v1075_v29 = vrot.slane %v1067_v35, %v2288_v18  ;;  %v1082_v46 = vrot.slane %v1068_v7, %v2288_v18  ;;  %v1091_v38 = vrot.slane %v1083_v40, %v2288_v18  ;;  %v1098_v61 = vrot.slane %v1084_v49, %v2288_v18  ;;  %v1851_v18 = vld [vmem:[%s2546_s4] sm:$0xff]   ;;  %s1975_s4 = smov [#allocation2]  }
 0x29f   :  { %1798 = vmatpush3.bf16.msra.mxu1 %v1851_v18  ;;  %v1935_v7 = vld [vmem:[%s2542_s0] sm:$0xff]  ;;  %s1640_s19 = sshll.u32 %s1975_s4, 4  ;;  %s1641_s19 = int_to_ptr.vmem [resolvable:$true] %s1640_s19 }
 0x2a0   :  { %v1100_v33 = vcombine.high %v2402_v6, %v1075_v29  ;;  %v1101_v28 = vcombine.low %v1050_v32, %v1082_v46  ;;  %v1102_v2 = vcombine.high %v1050_v32, %v1082_v46  ;;  %v1104_v14 = vcombine.high %v1059_v41, %v1091_v38  ;;  %1799 = vmatprep.subr.bf16.mxu1 %v1961_v1  ;;  %v1936_v46 = vld [vmem:[%s2542_s0 + $0x8] sm:$0xff]  ;;  %p1942_p1 = scmp.lt.s32.totalorder %s1641_s19, %s1641_s19 }
 0x2a1   :  { %v1103_v23 = vcombine.low %v1059_v41, %v1091_v38  ;;  %v1106_v21 = vcombine.high %v1066_v43, %v1098_v61  ;;  %v1105_v15 = vcombine.low %v1066_v43, %v1098_v61  ;;  %v1099_v22 = vcombine.low %v2402_v6, %v1075_v29 }
 0x2a2   :  { %1111 = vrot.lane.b32.xlu0 %v1100_v33, %s1969_s26  ;;  %1119 = vrot.lane.b32.xlu1 %v1101_v28, %s1968_s2 }
 0x2a3   :  { %1800 = vmatpush3.bf16.msra.mxu1 %v1852_v55 }
 0x2a4   :  { %1813 = vmatprep.subr.bf16.mxu1 %v1961_v1 }
 0x2a6   :  { %1127 = vrot.lane.b32.xlu0 %v1102_v2, %s1970_s27  ;;  %1143 = vrot.lane.b32.xlu1 %v1104_v14, %s1972_s29 }
 0x2aa   :  { %1135 = vrot.lane.b32.xlu0 %v1103_v23, %s1971_s28  ;;  %1159 = vrot.lane.b32.xlu1 %v1106_v21, %s1974_s14 }
 0x2ae   :  { %1151 = vrot.lane.b32.xlu0 %v1105_v15, %s1973_s30  ;;  %v1853_v15 = vld [vmem:[%s2549_s7] sm:$0xff]  }
 0x2b2   :  { %1262 = vrot.lane.b32.xlu0 %v1191_v26, %s1963_s1 }
 0x2e8   :  { %v1118_v62 = vpop.permute.xlu0 %1117  ;;  %v1110_v19 = vpop.permute.xlu1 %1109 }
 0x2e9   :  { %v1163_v54 = vsel %vm509_vm2, %v963_v42, %v1110_v19 }
 0x2ea   :  { %v1166_v10 = vsel %vm1165_vm3, %v1163_v54, %v1118_v62 }
 0x2ec   :  { %v1126_v20 = vpop.permute.xlu0 %1125 }
 0x2ed   :  { %v1169_v31 = vsel %vm1168_vm4, %v1166_v10, %v1126_v20 }
 0x2ef   :  { %v1134_v16 = vpop.permute.xlu1 %1133 }
 0x2f0   :  { %v1142_v39 = vpop.permute.xlu0 %1141  ;;  %v1171_v13 = vsel %vm65_vm1, %v1169_v31, %v1134_v16 }
 0x2f1   :  { %v1174_v12 = vsel %vm1173_vm5, %v1171_v13, %v1142_v39 }
 0x2f3   :  { %v1150_v34 = vpop.permute.xlu1 %1149 }
 0x2f4   :  { %v1177_v58 = vsel %vm1176_vm6, %v1174_v12, %v1150_v34 }
 0x2f7   :  { %v1158_v5 = vpop.permute.xlu1 %1157 }
 0x2f8   :  { %v1180_v42 = vsel %vm1179_vm7, %v1177_v58, %v1158_v5  ;;  %v1675_v58 = vld [vmem:[%s2547_s5] ss:$0 sm:$0xff] }
 0x2f9   :  { %v1182_v24 = vpack.c.bf16 %v1180_v42, %v1180_v42 }
 0x2fb   :  { %1782 = vmatmul.mubr.msk.bf16.vlgmr.msra.gmra.mrb[4].mxu0 %vm1208_vm8, %v1182_v24  ;;  %v1261_v17 = vpop.permute.xlu1 %1260 }
 0x2fc   :  { %1786 = vmatpush3.bf16.msra.mxu0 %v2145_v37  ;;  %1793 = vmatprep.mubr.msk.bf16.mxu0 %vm1962_vm0, %v1961_v1 }
 0x2fd   :  { %1787 = vmatprep.subr.bf16.mxu0 %v1961_v1 }
 0x300   :  { %1788 = vmatpush3.bf16.msra.mxu0 %v1259_v27 }
 0x301   :  { %1789 = vmatprep.subr.bf16.mxu0 %v1961_v1 }
 0x304   :  { %1790 = vmatpush3.bf16.msra.mxu0 %v1261_v17 }
 0x305   :  { %1791 = vmatprep.subr.bf16.mxu0 %v1961_v1 }
 0x314   :  { %v1112_v3 = vpop.permute.xlu0 %1111  ;;  %v1120_v11 = vpop.permute.xlu1 %1119 }
 0x315   :  { %v1164_v9 = vsel %vm509_vm2, %v1099_v22, %v1112_v3  ;;  %v1854_v22 = vld [vmem:[%s2549_s7 + $0x8] sm:$0xff]  }
 0x316   :  { %v1167_v25 = vsel %vm1165_vm3, %v1164_v9, %v1120_v11  ;;  %v1676_v11 = vld [vmem:[%s2548_s6] ss:$0 sm:$0xff] }
 0x318   :  { %v1128_v53 = vpop.permute.xlu0 %1127  ;;  %v1144_v37 = vpop.permute.xlu1 %1143 }
 0x319   :  { %v1170_v6 = vsel %vm1168_vm4, %v1167_v25, %v1128_v53 }
 0x31c   :  { %v1136_v32 = vpop.permute.xlu0 %1135  ;;  %v1160_v43 = vpop.permute.xlu1 %1159 }
 0x31d   :  { %v1172_v41 = vsel %vm65_vm1, %v1170_v6, %v1136_v32  ;;  %v1855_v6 = vld [vmem:[%s2551_s9] sm:$0xff]   ;;  %v1856_v32 = vld [vmem:[%s2551_s9 + $0x8] sm:$0xff]  }
 0x31e   :  { %v1175_v45 = vsel %vm1173_vm5, %v1172_v41, %v1144_v37  ;;  %v1857_v41 = vld [vmem:[%s2551_s9 + $0x10] sm:$0xff]  }
 0x320   :  { %v1152_v44 = vpop.permute.xlu0 %1151 }
 0x321   :  { %v1178_v51 = vsel %vm1176_vm6, %v1175_v45, %v1152_v44  ;;  %v1677_v44 = vld [vmem:[%s2550_s8] ss:$0 sm:$0xff] }
 0x322   :  { %v1181_v52 = vsel %vm1179_vm7, %v1178_v51, %v1160_v43  ;;  %v1858_v43 = vld [vmem:[%s2551_s9 + $0x18] sm:$0xff]  }
 0x323   :  { %v1183_v47 = vpack.c.bf16 %v1181_v52, %v1181_v52 }
 0x324   :  { %v1263_v57 = vpop.permute.xlu0 %1262 }
 0x325   :  { %1792 = vmatpush3.bf16.msra.mxu0 %v1263_v57 }
 0x326   :  { %1805 = vmatprep.subr.bf16.mxu0 %v1961_v1 }
 0x328   :  { %1794 = vmatmul.mubr.msk.bf16.vlgmr.msra.gmra.mrb[8].mxu0 %vm1208_vm8, %v1183_v47 }
 0x329   :  { %1809 = vmatprep.mubr.msk.bf16.mxu0 %vm1962_vm0, %v1961_v1  ;;  %1806 = vmatpush3.bf16.msra.mxu0 %v1853_v15 }
 0x32a   :  { %1807 = vmatprep.subr.bf16.mxu0 %v1961_v1 }
 0x32d   :  { %1808 = vmatpush3.bf16.msra.mxu0 %v1854_v22 }
 0x3ce   :  { %v1246_v56 = vpop.f32.mrb[4].mxu0 }
 0x3cf   :  { %v1783_v48 = vpop.f32.mrb[5].mxu0 }
 0x3d0   :  { %v1249_v50 = vpop.f32.mrb[6].mxu0 }
 0x3d1   :  { %v1784_v8 = vpop.f32.mrb[7].mxu0 }
 0x3fb   :  { %v1305_v59 = vpop.f32.mrb[8].mxu0 }
 0x3fc   :  { %v1311_v60 = vpack.c.bf16 %v1305_v59, %v1246_v56  ;;  %v1795_v63 = vpop.f32.mrb[9].mxu0 }
 0x3fd   :  { %v1308_v36 = vpop.f32.mrb[10].mxu0 }
 0x3fe   :  { %v1796_v4 = vpop.f32.mrb[11].mxu0  ;;  %1802 = vmatmul.mubr.msk.bf16.vlgmr.msra.gmra.mrb[16].mxu1 %vm65_vm1, %v1311_v60 }
 0x3ff   :  { %1821 = vmatprep.mubr.msk.bf16.mxu1 %vm1962_vm0, %v1961_v1  ;;  %1814 = vmatpush3.bf16.msra.mxu1 %v1855_v6 }
 0x400   :  { %1815 = vmatprep.subr.bf16.mxu1 %v1961_v1 }
 0x403   :  { %1816 = vmatpush3.bf16.msra.mxu1 %v1856_v32 }
 0x404   :  { %1817 = vmatprep.subr.bf16.mxu1 %v1961_v1 }
 0x407   :  { %1818 = vmatpush3.bf16.msra.mxu1 %v1857_v41 }
 0x408   :  { %1819 = vmatprep.subr.bf16.mxu1 %v1961_v1 }
 0x40b   :  { %1820 = vmatpush3.bf16.msra.mxu1 %v1858_v43 }
 0x4d1   :  { %v1365_v35 = vpop.f32.mrb[16].mxu1 }
 0x4d2   :  { %v1366_v40 = vadd.f32 %v1935_v7, %v1365_v35  ;;  %v1803_v49 = vpop.f32.mrb[17].mxu1  ;;  %v1681_v7 = vld [vmem:[%s2552_s10] ss:$0 sm:$0xff] }
 0x4d3   :  { %v1368_v29 = vpop.f32.mrb[18].mxu1 }
 0x4d4   :  { %v1369_v38 = vadd.f32 %v1936_v46, %v1368_v29  ;;  %v1804_v61 = vpop.f32.mrb[19].mxu1  ;;  %v1372_v33 = vsel %vm65_vm1, %v1366_v40, 0.0  ;;  %v1381_v14 = vmul.f32 %v1366_v40, %v1366_v40 }
 0x4d5   :  { %1373 = vadd.xlane.f32.xlu1 %v1372_v33 }
 0x4d6   :  { %v1375_v28 = vsel %vm65_vm1, %v1369_v38, 0.0  ;;  %v1382_v2 = vmul.f32 %v1369_v38, %v1369_v38  ;;  %v1383_v21 = vsel %vm65_vm1, %v1381_v14, 0.0 }
 0x4d7   :  { %1376 = vadd.xlane.f32.xlu0 %v1375_v28 }
 0x4d8   :  { %v1386_v23 = vsel %vm65_vm1, %v1382_v2, 0.0 }
 0x4d9   :  { %1387 = vadd.xlane.f32.xlu1 %v1386_v23 }
 0x4db   :  { %1384 = vadd.xlane.f32.xlu0 %v1383_v21 }
 0x562   :  { %v1374_v18 = vpop.xlane.xlu1 %1373 }
 0x563   :  { %v1379_v0 = vmul.f32 0.03125, %v1374_v18 }
 0x564   :  { %v1377_v30 = vpop.xlane.xlu0 %1376 }
 0x565   :  { %v1380_v26 = vmul.f32 0.03125, %v1377_v30  ;;  %v1391_v20 = vmul.f32 %v1379_v0, %v1379_v0  ;;  %v1395_v5 = vsub.f32 %v1366_v40, %v1379_v0 }
 0x566   :  { %v1388_v27 = vpop.xlane.xlu1 %1387 }
 0x567   :  { %v1392_v62 = vmul.f32 %v1380_v26, %v1380_v26  ;;  %v1390_v19 = vmul.f32 0.03125, %v1388_v27  ;;  %v1396_v34 = vsub.f32 %v1369_v38, %v1380_v26 }
 0x568   :  { %v1385_v54 = vpop.xlane.xlu0 %1384 }
 0x569   :  { %v1394_v10 = vsub.f32 %v1390_v19, %v1392_v62  ;;  %v1389_v16 = vmul.f32 0.03125, %v1385_v54 }
 0x56b   :  { %v1398_v31 = vadd.f32 1e-05, %v1394_v10  ;;  %v1393_v39 = vsub.f32 %v1389_v16, %v1391_v20 }
 0x56d   :  { %1923 = vrsqrt.f32 %v1398_v31  ;;  %v1397_v13 = vadd.f32 1e-05, %v1393_v39 }
 0x56f   :  { %1925 = vrsqrt.f32 %v1397_v13 }
 0x577   :  { %v1924_v12 = vpop.eup %1923 }
 0x578   :  { %v1402_v42 = vmul.f32 %v1924_v12, %v1396_v34 }
 0x579   :  { %v1926_v24 = vpop.eup %1925 }
 0x57a   :  { %v1401_v17 = vmul.f32 %v1926_v24, %v1395_v5  ;;  %v1411_v3 = vmul.f32 %v1675_v58, %v1402_v42 }
 0x57c   :  { %v1410_v9 = vmul.f32 %v1675_v58, %v1401_v17  ;;  %v1420_v25 = vadd.f32 %v1676_v11, %v1411_v3  ;;  %v1687_v58 = vld [vmem:[%s2553_s11] ss:$0 sm:$0xff]  ;;  %s1937_s11 = scalar_lea.vmem %s1641_s19, 256 }
 0x57d   :  { %v1688_v17 = vld [vmem:[%s2554_s12] ss:$0 sm:$0xff]  ;;  %p1938_p0 = scmp.ne.s32.totalorder %s1641_s19, %s1937_s11  ;;  %p1943_p2 = scmp.lt.s32.totalorder %s1937_s11, %s1937_s11 }
 0x57e   :  { %v1419_v53 = vadd.f32 %v1676_v11, %v1410_v9 }
 0x57f   :  { %p1944_p3 = por %p1943_p2, %p1942_p1 }
 0x580   :  { %v1421_v37 = vpack.c.bf16 %v1420_v25, %v1419_v53 }
 0x581   :  { %p1945_p4 = pnand %p1944_p3, %p1938_p0 }
 0x582   :  { %1810 = vmatmul.mubr.msk.bf16.vlgmr.msra.gmra.mrb[12].mxu0 %vm65_vm1, %v1421_v37 }
 0x655   :  { %v1482_v45 = vpop.f32.mrb[12].mxu0 }
 0x656   :  { %v1483_v51 = vadd.f32 %v1677_v44, %v1482_v45  ;;  %v1811_v52 = vpop.f32.mrb[13].mxu0 }
 0x657   :  { %v1485_v57 = vpop.f32.mrb[14].mxu0 }
 0x658   :  { %v1491_v47 = vmul.f32 0.70710677, %v1483_v51  ;;  %v1486_v55 = vadd.f32 %v1677_v44, %v1485_v57  ;;  %v1812_v56 = vpop.f32.mrb[15].mxu0  ;;  %v1489_v59 = vmul.f32 0.5, %v1483_v51 }
 0x65a   :  { %1927 = verf.f32 %v1491_v47  ;;  %v1492_v48 = vmul.f32 0.70710677, %v1486_v55  ;;  %v1490_v60 = vmul.f32 0.5, %v1486_v55 }
 0x65c   :  { %1929 = verf.f32 %v1492_v48 }
 0x664   :  { %v1928_v1 = vpop.eup %1927 }
 0x665   :  { %v1495_v50 = vadd.f32 1.0, %v1928_v1 }
 0x666   :  { %v1930_v8 = vpop.eup %1929 }
 0x667   :  { %v1496_v63 = vadd.f32 1.0, %v1930_v8  ;;  %v1497_v36 = vmul.f32 %v1495_v50, %v1489_v59 }
 0x669   :  { %v1498_v4 = vmul.f32 %v1496_v63, %v1490_v60 }
 0x66b   :  { %v1499_v35 = vpack.c.bf16 %v1498_v4, %v1497_v36 }
 0x66d   :  { %1822 = vmatmul.mubr.msk.bf16.vlgmr.msra.gmra.mrb[20].mxu1 %vm1208_vm8, %v1499_v35 }
 0x740   :  { %v1576_v40 = vpop.f32.mrb[20].mxu1 }
 0x741   :  { %v1577_v49 = vadd.f32 %v1681_v7, %v1576_v40  ;;  %v1823_v29 = vpop.f32.mrb[21].mxu1 }
 0x742   :  { %v1579_v46 = vpop.f32.mrb[22].mxu1 }
 0x743   :  { %v1583_v38 = vadd.f32 %v1577_v49, %v1419_v53  ;;  %v1580_v61 = vadd.f32 %v1681_v7, %v1579_v46  ;;  %v1824_v33 = vpop.f32.mrb[23].mxu1 }
 0x745   :  { %v1584_v28 = vadd.f32 %v1580_v61, %v1420_v25  ;;  %v1585_v2 = vsel %vm65_vm1, %v1583_v38, 0.0  ;;  %v1593_v14 = vmul.f32 %v1583_v38, %v1583_v38 }
 0x746   :  { %1586 = vadd.xlane.f32.xlu0 %v1585_v2 }
 0x747   :  { %v1588_v23 = vsel %vm65_vm1, %v1584_v28, 0.0  ;;  %v1594_v21 = vmul.f32 %v1584_v28, %v1584_v28  ;;  %v1595_v15 = vsel %vm65_vm1, %v1593_v14, 0.0 }
 0x748   :  { %1589 = vadd.xlane.f32.xlu1 %v1588_v23 }
 0x749   :  { %v1598_v22 = vsel %vm65_vm1, %v1594_v21, 0.0 }
 0x74a   :  { %1596 = vadd.xlane.f32.xlu0 %v1595_v15 }
 0x74c   :  { %1599 = vadd.xlane.f32.xlu1 %v1598_v22 }
 0x7d3   :  { %v1587_v18 = vpop.xlane.xlu0 %1586 }
 0x7d4   :  { %v1591_v30 = vmul.f32 0.03125, %v1587_v18 }
 0x7d5   :  { %v1590_v0 = vpop.xlane.xlu1 %1589 }
 0x7d6   :  { %v1592_v26 = vmul.f32 0.03125, %v1590_v0  ;;  %v1603_v62 = vmul.f32 %v1591_v30, %v1591_v30  ;;  %v1607_v34 = vsub.f32 %v1583_v38, %v1591_v30 }
 0x7d7   :  { %v1597_v27 = vpop.xlane.xlu0 %1596 }
 0x7d8   :  { %v1601_v19 = vmul.f32 0.03125, %v1597_v27  ;;  %v1604_v20 = vmul.f32 %v1592_v26, %v1592_v26  ;;  %v1608_v5 = vsub.f32 %v1584_v28, %v1592_v26 }
 0x7d9   :  { %v1600_v54 = vpop.xlane.xlu1 %1599 }
 0x7da   :  { %v1605_v10 = vsub.f32 %v1601_v19, %v1603_v62  ;;  %v1602_v16 = vmul.f32 0.03125, %v1600_v54 }
 0x7dc   :  { %v1609_v31 = vadd.f32 1e-05, %v1605_v10  ;;  %v1606_v39 = vsub.f32 %v1602_v16, %v1604_v20 }
 0x7de   :  { %1931 = vrsqrt.f32 %v1609_v31  ;;  %v1610_v13 = vadd.f32 1e-05, %v1606_v39 }
 0x7e0   :  { %1933 = vrsqrt.f32 %v1610_v13 }
 0x7e8   :  { %v1932_v12 = vpop.eup %1931 }
 0x7e9   :  { %v1613_v42 = vmul.f32 %v1932_v12, %v1607_v34 }
 0x7ea   :  { %v1934_v24 = vpop.eup %1933 }
 0x7eb   :  { %v1614_v3 = vmul.f32 %v1934_v24, %v1608_v5  ;;  %v1622_v11 = vmul.f32 %v1687_v58, %v1613_v42 }
 0x7ed   :  { %v1623_v9 = vmul.f32 %v1687_v58, %v1614_v3  ;;  %v1631_v53 = vadd.f32 %v1688_v17, %v1622_v11 }
 0x7ef   :  { %v1632_v25 = vadd.f32 %v1688_v17, %v1623_v9  ;;  %1633 = vst.msk [vmem:[#allocation2] sm:$0xff] %vm65_vm1, %v1631_v53 }
 0x7f1   :  { %1634 = vst.msk [vmem:[#allocation2 + $0x8] sm:$0xff] %vm65_vm1, %v1632_v25 }
 0x7f2   :  { %1948 = shalt.err (!%p1945_p4)
}
 0x7f3   :  { %s1949_s20 = scalar_lea.hbm %s2555_s13, 256 }
 0x7f4   :  { %p1950_p5 = scmp.ne.s32.totalorder %s2555_s13, %s1949_s20  ;;  %p1953_p6 = scmp.lt.u32.totalorder %s1949_s20, %s2555_s13 }
 0x7f6   :  { %p1955_p7 = pnand %p1953_p6, %p1950_p5 }
 0x7f8   :  { %1958 = shalt.err (!%p1955_p7)
}
 0x7f9   :  { %s1976_s23 = smov 128  }
 0x7fa   :  { %1646 = dma.vmem_to_hbm [thread:$0]  %s1641_s19, 256, %s2555_s13, [#allocation3], %s1976_s23, %s1976_s23, %s1969_s26  }
 0x7fb   :  { %1959 = dma.done.wait [#allocation3], 256  }
 0x7fc   :  { %1960 = vsyncadd [#allocation3], 4294967040 }
 0x7fd   :  { %1650 = vsyncpa [#allocation3], 1 }

</bundles_post_ra>
